<compile_context>
chip_gen: v7x
topology: tpu7x:2x2x1
jax: 0.10.0
libtpu: 0.0.40
codegen_flags: <defaults>
</compile_context>

<pallas_src>
import functools
import math

import jax
import jax.numpy as jnp
from jax.experimental import pallas as pl
from jax.experimental.pallas import tpu as pltpu


def _round_up(n, m):
    return ((n + m - 1) // m) * m


def _genagg_kernel(p_ref, a_ref, ecount_ref, idx_ref, x_ref, out_ref,
                   acc_ref, m_ref, cnt_ref, *, mxu_bf16=False):
    # p_ref, a_ref  : SMEM (1,) f32 scalars
    # ecount_ref    : SMEM (1,) int32  true number of edges E (x is unpadded)
    # idx_ref       : VMEM [1, t_e] int32 segment ids for this E tile (-1 = pad)
    # x_ref         : VMEM [t_e, t_f] input tile (unpadded in E -> tail is garbage)
    # out_ref       : VMEM [V_pad, t_f] output (written on the last E step only)
    # acc_ref       : VMEM [V_pad, t_f] f32 scratch (scatter-sum of exp(z - m))
    # m_ref         : VMEM [1, t_f] f32 scratch (running column max of z)
    # cnt_ref       : VMEM [V_pad, 1] f32 scratch (segment counts N)
    e_idx = pl.program_id(1)
    n_e = pl.num_programs(1)

    t_e = x_ref.shape[0]
    v_pad = acc_ref.shape[0]
    t_v = v_pad if v_pad <= 256 else 256          # matches wrapper's V_pad rounding
    n_chunks = v_pad // t_v

    @pl.when(e_idx == 0)
    def _():
        acc_ref[...] = jnp.zeros_like(acc_ref)
        cnt_ref[...] = jnp.zeros_like(cnt_ref)
        # finite sentinel (not -inf) so exp(m_old - m_new) stays well defined;
        # any valid shift leaves c + log(S) mathematically unchanged.
        m_ref[...] = jnp.full_like(m_ref, -1e30)

    p = p_ref[0]
    x = x_ref[...].astype(jnp.float32)            # bf16 inputs upcast in-register
    z = p * jnp.log(jnp.abs(x))                   # [t_e, t_f]

    # Rows past the true edge count are HBM garbage (x is not padded): force a
    # huge negative so they cannot poison the column max; their exp(z - m)
    # underflows to 0 and their idx (-1) never matches a segment anyway.
    row = e_idx * t_e + jax.lax.broadcasted_iota(jnp.int32, (t_e, 1), 0)
    z = jnp.where(row < ecount_ref[0], z, -1e30)

    # --- flash-style running column max with accumulator rescale ---
    m_old = m_ref[...]                            # [1, t_f]
    m_new = jnp.maximum(m_old, jnp.max(z, axis=0, keepdims=True))
    m_ref[...] = m_new
    shifted = jnp.exp(z - m_new)                  # [t_e, t_f]

    @pl.when(e_idx > 0)                           # acc is zero on the first step
    def _():
        acc_ref[...] = acc_ref[...] * jnp.exp(m_old - m_new)

    dot_dtype = jnp.bfloat16 if mxu_bf16 else jnp.float32
    shifted_d = shifted.astype(dot_dtype)
    idx_row = idx_ref[...]                        # [1, t_e]
    # hoisted once per grid step (JAX does not CSE broadcast_in_dim)
    base = jax.lax.broadcasted_iota(jnp.int32, (t_v, t_e), 0)

    def accumulate(v0, sl):
        match = (base + v0) == idx_row            # [t_v, t_e]; full [V,E] never built
        onehot = match.astype(dot_dtype)
        acc_ref[sl, :] += jnp.dot(onehot, shifted_d,
                                  preferred_element_type=jnp.float32)
        # segment counts for free on the otherwise idle XLU slot
        cnt_ref[sl, :] += jnp.sum(match.astype(jnp.float32), axis=1, keepdims=True)

    if n_chunks == 1:
        accumulate(0, slice(None))
    else:
        def body(i, carry):
            v0 = pl.multiple_of(i * t_v, t_v)
            accumulate(v0, pl.ds(v0, t_v))
            return carry
        jax.lax.fori_loop(0, n_chunks, body, 0, unroll=(n_chunks <= 8))

    @pl.when(e_idx == n_e - 1)
    def _():
        a = a_ref[0]
        inv_p = 1.0 / p
        log_n = jnp.log(jnp.maximum(cnt_ref[...], 1.0))   # N[N==0] = 1, [V_pad, 1]
        c = m_ref[...]                                     # [1, t_f]
        s = acc_ref[...]                                   # [V_pad, t_f]
        out_ref[...] = jnp.exp((a - inv_p) * log_n
                               + inv_p * (c + jnp.log(s))).astype(out_ref.dtype)


def gen_agg_sparse_pallas(x, index, p_param, a_param, dim_size,
                          p_domain=(-1.9999, 1.9999),
                          tile_f=None, tile_e=None,
                          mxu_bf16=False, out_dtype=jnp.float32):
    """x: [E, F] (f32/bf16), index: [E] int32 in [0, dim_size). Returns [dim_size, F]."""
    E, F = x.shape
    V = int(dim_size)
    if E == 0:                                    # matches the torch x.numel()==0 branch
        return jnp.zeros((V, F), out_dtype)

    # ---- parameter glue (matches GenAggSparse.forward): clamp p, p -> tan(p*pi/4) ----
    p_clamped = jnp.clip(jnp.asarray(p_param, jnp.float32).reshape(-1)[:1],
                         p_domain[0], p_domain[1])
    p_mapped = jnp.tan(p_clamped * (math.pi / 4.0)).reshape(1)
    a_val = jnp.asarray(a_param, jnp.float32).reshape(-1)[:1]
    e_count = jnp.array([E], jnp.int32)

    # ---- F tiling: lanes stay multiples of 128; pad x in F only if misaligned ----
    F_pad = _round_up(F, 128)
    if tile_f is not None:
        t_f = tile_f
        assert t_f % 128 == 0 and F_pad % t_f == 0
    else:
        t_f = next(c for c in (512, 256, 128) if F_pad % c == 0)
        if F_pad // t_f < 2 and F_pad > 128:
            t_f //= 2                              # >= 2 parallel f steps for v7x megacore

    # ---- E tiling: one full-E tile when small, else 1024-row tiles (unpadded x) ----
    if tile_e is not None:
        t_e = tile_e
        assert t_e == E or t_e % 128 == 0
    else:
        t_e = E if E <= 1024 else 1024

    # ---- V: full-V accumulator in VMEM, chunked at 256 rows inside the kernel ----
    V_pad = _round_up(V, 8)
    if V_pad > 256:
        V_pad = _round_up(V_pad, 256)

    x_itemsize = jnp.dtype(x.dtype).itemsize

    def vmem_est(te, tf):
        return (V_pad * tf * 4                 # acc scratch
                + 2 * V_pad * tf * 4           # out block, double-buffered
                + V_pad * 128 * 4              # counts (lane padded)
                + 2 * te * tf * x_itemsize     # x tile, double-buffered
                + 2 * 8 * te * 4               # idx tile
                + 2 * 8 * tf * 4)              # running max + slack

    BUDGET = 28 << 20                          # safe for v7x 64 MiB/TC; roomy on v5e/v6e
    while vmem_est(t_e, t_f) > BUDGET and t_f > 128 and tile_f is None:
        t_f //= 2
    while vmem_est(t_e, t_f) > BUDGET and t_e > 1024 and tile_e is None:
        t_e //= 2
    if vmem_est(t_e, t_f) > BUDGET:
        # TODO(synk): fall back to a V-tiled grid / sorted-index block-skip here.
        raise NotImplementedError("dim_size too large for the full-V VMEM accumulator")

    n_f = F_pad // t_f
    n_e = (E + t_e - 1) // t_e
    E_idx = n_e * t_e

    # tiny idx stream: pad with -1 (never matches a segment)
    index = jnp.asarray(index, jnp.int32)
    idx_p = jnp.full((1, E_idx), -1, jnp.int32).at[0, :E].set(index)

    # x: no E padding (tail rows masked in-kernel); pad F only when misaligned
    x_in = x if F_pad == F else jnp.pad(x, ((0, 0), (0, F_pad - F)), constant_values=1.0)

    vmem_limit = min(48 << 20, max(32 << 20, int(vmem_est(t_e, t_f) * 1.5) + (2 << 20)))

    cost = pl.CostEstimate(
        flops=2 * V_pad * E_idx * F_pad + 6 * E_idx * F_pad,
        transcendentals=3 * E_idx * F_pad + 2 * V_pad * F_pad,
        bytes_accessed=(x_in.size * x_itemsize + idx_p.size * 4
                        + V_pad * F_pad * jnp.dtype(out_dtype).itemsize),
    )

    kernel = functools.partial(_genagg_kernel, mxu_bf16=mxu_bf16)

    out = pl.pallas_call(
        kernel,
        out_shape=jax.ShapeDtypeStruct((V_pad, F_pad), out_dtype),
        grid_spec=pltpu.PrefetchScalarGridSpec(
            num_scalar_prefetch=0,
            grid=(n_f, n_e),
            in_specs=[
                pl.BlockSpec(memory_space=pltpu.MemorySpace.SMEM),   # p
                pl.BlockSpec(memory_space=pltpu.MemorySpace.SMEM),   # a
                pl.BlockSpec(memory_space=pltpu.MemorySpace.SMEM),   # true E
                pl.BlockSpec((1, t_e), lambda f, e: (0, e)),         # idx   [1, E_idx]
                pl.BlockSpec((t_e, t_f), lambda f, e: (e, f)),       # x     [E, F_pad]
            ],
            out_specs=pl.BlockSpec((V_pad, t_f), lambda f, e: (0, f)),
            scratch_shapes=[
                pltpu.VMEM((V_pad, t_f), jnp.float32),               # accumulator
                pltpu.VMEM((1, t_f), jnp.float32),                   # running max
                pltpu.VMEM((V_pad, 1), jnp.float32),                 # counts
            ],
        ),
        compiler_params=pltpu.CompilerParams(
            dimension_semantics=("parallel", "arbitrary"),
            vmem_limit_bytes=vmem_limit),
        cost_estimate=cost,
    )(p_mapped, a_val, e_count, idx_p, x_in)

    return out[:V, :F]


def _reference_jax(x, index, p_param, a_param, dim_size, p_domain=(-1.9999, 1.9999)):
    """Pure-JAX reference mirroring the PyTorch code path."""
    p = jnp.tan(jnp.clip(jnp.asarray(p_param, jnp.float32), p_domain[0], p_domain[1])
                * (math.pi / 4.0))[0]
    a = jnp.asarray(a_param, jnp.float32)[0]
    z = p * jnp.log(jnp.abs(x.astype(jnp.float32)))
    c = jnp.max(z, axis=0, keepdims=True)
    shifted = jnp.exp(z - c)
    summed = jnp.zeros((dim_size, x.shape[1]), jnp.float32).at[index].add(shifted)
    counts = jnp.zeros((dim_size,), jnp.float32).at[index].add(1.0)
    counts = jnp.where(counts == 0.0, 1.0, counts)[:, None]
    return jnp.exp(a * jnp.log(counts)
                   + (1.0 / p) * (-jnp.log(counts) + c + jnp.log(summed)))


if __name__ == "__main__":
    key = jax.random.PRNGKey(0)
    k1, k2, k3, k4 = jax.random.split(key, 4)

    # --- Test 1: default tiling (single E tile, single V chunk, 2 parallel F tiles) ---
    E, F, V = 300, 256, 10
    x = jax.random.normal(k1, (E, F), dtype=jnp.float32)
    index = jax.random.randint(k2, (E,), 0, V, dtype=jnp.int32)
    p_param = jnp.array([0.7], jnp.float32)
    a_param = jnp.array([0.3], jnp.float32)

    ref = _reference_jax(x, index, p_param, a_param, V)
    out = jax.block_until_ready(gen_agg_sparse_pallas(x, index, p_param, a_param, V))
    assert out.shape == (V, F)
    assert jnp.allclose(out, ref, rtol=2e-4, atol=1e-5), "mismatch vs reference (default)"

    # --- Test 2: forced small tiles -> multi-step running max, idx padding, F grid ---
    out2 = jax.block_until_ready(
        gen_agg_sparse_pallas(x, index, p_param, a_param, V, tile_f=128, tile_e=128))
    assert jnp.allclose(out2, ref, rtol=2e-4, atol=1e-5), "mismatch vs reference (small tiles)"

    # --- Test 3: negative p, larger V -> chunked in-kernel V loop + partial last E tile ---
    E3, F3, V3 = 700, 128, 300
    x3 = jax.random.normal(k3, (E3, F3), dtype=jnp.float32)
    index3 = jnp.concatenate([jnp.arange(V3, dtype=jnp.int32),      # every segment non-empty
                              jax.random.randint(k4, (E3 - V3,), 0, V3, dtype=jnp.int32)])
    p3 = jnp.array([-0.6], jnp.float32)
    a3 = jnp.array([0.25], jnp.float32)
    ref3 = _reference_jax(x3, index3, p3, a3, V3)
    out3 = jax.block_until_ready(
        gen_agg_sparse_pallas(x3, index3, p3, a3, V3, tile_e=256))
    assert out3.shape == (V3, F3)
    assert jnp.allclose(out3, ref3, rtol=2e-4, atol=1e-5), "mismatch vs reference (chunked V)"

    print("KERNEL_OK")
</pallas_src>

<mosaic_0001>
module attributes {stable_mosaic.version = 11 : i64} {
  func.func @_genagg_kernel(%arg0: i32, %arg1: i32, %arg2: memref<1xf32, #tpu.memory_space<smem>>, %arg3: memref<1xf32, #tpu.memory_space<smem>>, %arg4: memref<1xi32, #tpu.memory_space<smem>>, %arg5: memref<1x300xi32, #tpu.memory_space<vmem>>, %arg6: memref<300x128xf32, #tpu.memory_space<vmem>>, %arg7: memref<16x128xf32, #tpu.memory_space<vmem>>, %arg8: memref<16x128xf32, #tpu.memory_space<vmem>>, %arg9: memref<1x128xf32, #tpu.memory_space<vmem>>, %arg10: memref<16x1xf32, #tpu.memory_space<vmem>>) attributes {dimension_semantics = [#tpu.dimension_semantics<parallel>, #tpu.dimension_semantics<arbitrary>], iteration_bounds = array<i64: 2, 1>, scalar_prefetch = 0 : i64, scratch_operands = 3 : i64, tpu.core_type = #tpu.core_type<tc>, window_params = [{transform_indices = @transform_0, window_bounds = array<i64: 1>}, {transform_indices = @transform_1, window_bounds = array<i64: 1>}, {transform_indices = @transform_2, window_bounds = array<i64: 1>}, {transform_indices = @transform_3, window_bounds = array<i64: 1, 300>}, {transform_indices = @transform_4, window_bounds = array<i64: 300, 128>}, {transform_indices = @transform_5, window_bounds = array<i64: 16, 128>}]} {
    %c0_i32 = arith.constant 0 : i32
    %0 = arith.cmpi eq, %arg1, %c0_i32 : i32
    %1 = arith.extui %0 : i1 to i32
    %c0_i32_0 = arith.constant 0 : i32
    %2 = arith.cmpi ne, %1, %c0_i32_0 : i32
    scf.if %2 {
      %cst_26 = arith.constant 0.000000e+00 : f32
      %53 = vector.broadcast %cst_26 : f32 to vector<16x128xf32>
      %c0_27 = arith.constant 0 : index
      %c0_28 = arith.constant 0 : index
      %54 = vector.load %arg8[%c0_27, %c0_28] : memref<16x128xf32, #tpu.memory_space<vmem>>, vector<16x128xf32>
      tpu.vector_store %arg8[%c0_27, %c0_28], %53 {strides = array<i32>} : memref<16x128xf32, #tpu.memory_space<vmem>>, vector<16x128xf32>,
      %cst_29 = arith.constant 0.000000e+00 : f32
      %55 = vector.broadcast %cst_29 : f32 to vector<16x1xf32>
      %c0_30 = arith.constant 0 : index
      %c0_31 = arith.constant 0 : index
      %56 = vector.load %arg10[%c0_30, %c0_31] : memref<16x1xf32, #tpu.memory_space<vmem>>, vector<16x1xf32>
      tpu.vector_store %arg10[%c0_30, %c0_31], %55 {strides = array<i32>} : memref<16x1xf32, #tpu.memory_space<vmem>>, vector<16x1xf32>,
      %cst_32 = arith.constant -1.000000e+30 : f32
      %57 = vector.broadcast %cst_32 : f32 to vector<1x128xf32>
      %c0_33 = arith.constant 0 : index
      %c0_34 = arith.constant 0 : index
      %58 = vector.load %arg9[%c0_33, %c0_34] : memref<1x128xf32, #tpu.memory_space<vmem>>, vector<1x128xf32>
      tpu.vector_store %arg9[%c0_33, %c0_34], %57 {strides = array<i32>} : memref<1x128xf32, #tpu.memory_space<vmem>>, vector<1x128xf32>,
    } else {
    }
    %c0 = arith.constant 0 : index
    %3 = memref.load %arg2[%c0] : memref<1xf32, #tpu.memory_space<smem>>
    %c0_1 = arith.constant 0 : index
    %c0_2 = arith.constant 0 : index
    %4 = vector.load %arg6[%c0_1, %c0_2] : memref<300x128xf32, #tpu.memory_space<vmem>>, vector<300x128xf32>
    %5 = math.absf %4 : vector<300x128xf32>
    %6 = math.log %5 : vector<300x128xf32>
    %7 = vector.broadcast %3 : f32 to vector<300x128xf32>
    %8 = arith.mulf %7, %6 : vector<300x128xf32>
    %c300_i32 = arith.constant 300 : i32
    %9 = arith.muli %arg1, %c300_i32 : i32
    %10 = tpu.iota {dimensions = array<i32: 0>} : vector<300x1xi32>
    %11 = vector.broadcast %9 : i32 to vector<300x1xi32>
    %12 = arith.addi %11, %10 : vector<300x1xi32>
    %c0_3 = arith.constant 0 : index
    %13 = memref.load %arg4[%c0_3] : memref<1xi32, #tpu.memory_space<smem>>
    %14 = vector.broadcast %13 : i32 to vector<300x1xi32>
    %15 = arith.cmpi slt, %12, %14 : vector<300x1xi32>
    %cst = arith.constant -1.000000e+30 : f32
    %16 = vector.shape_cast %15 : vector<300x1xi1> to vector<300x1xi1>
    %17 = vector.broadcast %16 : vector<300x1xi1> to vector<300x128xi1>
    %18 = vector.broadcast %cst : f32 to vector<300x128xf32>
    %19 = arith.select %17, %8, %18 : vector<300x128xi1>, vector<300x128xf32>
    %c0_4 = arith.constant 0 : index
    %c0_5 = arith.constant 0 : index
    %20 = vector.load %arg9[%c0_4, %c0_5] : memref<1x128xf32, #tpu.memory_space<vmem>>, vector<1x128xf32>
    %cst_6 = arith.constant dense<0xFF800000> : vector<128xf32>
    %21 = vector.multi_reduction <maximumf>, %19, %cst_6 [0] : vector<300x128xf32> to vector<128xf32>
    %22 = vector.shape_cast %21 : vector<128xf32> to vector<1x128xf32>
    %23 = arith.maximumf %20, %22 : vector<1x128xf32>
    %c0_7 = arith.constant 0 : index
    %c0_8 = arith.constant 0 : index
    %24 = vector.load %arg9[%c0_7, %c0_8] : memref<1x128xf32, #tpu.memory_space<vmem>>, vector<1x128xf32>
    tpu.vector_store %arg9[%c0_7, %c0_8], %23 {strides = array<i32>} : memref<1x128xf32, #tpu.memory_space<vmem>>, vector<1x128xf32>,
    %25 = vector.broadcast %23 : vector<1x128xf32> to vector<300x128xf32>
    %26 = arith.subf %19, %25 : vector<300x128xf32>
    %27 = math.exp %26 : vector<300x128xf32>
    %c0_i32_9 = arith.constant 0 : i32
    %28 = arith.cmpi sgt, %arg1, %c0_i32_9 : i32
    %29 = arith.extui %28 : i1 to i32
    %c0_i32_10 = arith.constant 0 : i32
    %30 = arith.cmpi ne, %29, %c0_i32_10 : i32
    scf.if %30 {
      %c0_26 = arith.constant 0 : index
      %c0_27 = arith.constant 0 : index
      %53 = vector.load %arg8[%c0_26, %c0_27] : memref<16x128xf32, #tpu.memory_space<vmem>>, vector<16x128xf32>
      %54 = arith.subf %20, %23 : vector<1x128xf32>
      %55 = math.exp %54 : vector<1x128xf32>
      %56 = vector.broadcast %55 : vector<1x128xf32> to vector<16x128xf32>
      %57 = arith.mulf %53, %56 : vector<16x128xf32>
      %c0_28 = arith.constant 0 : index
      %c0_29 = arith.constant 0 : index
      %58 = vector.load %arg8[%c0_28, %c0_29] : memref<16x128xf32, #tpu.memory_space<vmem>>, vector<16x128xf32>
      tpu.vector_store %arg8[%c0_28, %c0_29], %57 {strides = array<i32>} : memref<16x128xf32, #tpu.memory_space<vmem>>, vector<16x128xf32>,
    } else {
    }
    %c0_11 = arith.constant 0 : index
    %c0_12 = arith.constant 0 : index
    %31 = vector.load %arg5[%c0_11, %c0_12] : memref<1x300xi32, #tpu.memory_space<vmem>>, vector<1x300xi32>
    %32 = tpu.iota {dimensions = array<i32: 0>} : vector<16x300xi32>
    %c0_i32_13 = arith.constant 0 : i32
    %33 = vector.broadcast %c0_i32_13 : i32 to vector<16x300xi32>
    %34 = arith.addi %32, %33 : vector<16x300xi32>
    %35 = vector.broadcast %31 : vector<1x300xi32> to vector<16x300xi32>
    %36 = arith.cmpi eq, %34, %35 : vector<16x300xi32>
    %37 = arith.extui %36 : vector<16x300xi1> to vector<16x300xi32>
    %38 = arith.sitofp %37 : vector<16x300xi32> to vector<16x300xf32>
    %c0_14 = arith.constant 0 : index
    %c0_15 = arith.constant 0 : index
    %39 = vector.load %arg8[%c0_14, %c0_15] : memref<16x128xf32, #tpu.memory_space<vmem>>, vector<16x128xf32>
    %cst_16 = arith.constant dense<0.000000e+00> : vector<16x128xf32>
    %40 = tpu.matmul %38, %27, %cst_16 {dimension_numbers = #tpu.dot_dimension_numbers<[1], [0], [0], [1], [0, 0, 1, 1], [], []>} : vector<16x300xf32>, vector<300x128xf32>, vector<16x128xf32> -> vector<16x128xf32>
    %41 = arith.addf %39, %40 : vector<16x128xf32>
    %c0_17 = arith.constant 0 : index
    %c0_18 = arith.constant 0 : index
    %42 = vector.load %arg8[%c0_17, %c0_18] : memref<16x128xf32, #tpu.memory_space<vmem>>, vector<16x128xf32>
    tpu.vector_store %arg8[%c0_17, %c0_18], %41 {strides = array<i32>} : memref<16x128xf32, #tpu.memory_space<vmem>>, vector<16x128xf32>,
    %c0_19 = arith.constant 0 : index
    %c0_20 = arith.constant 0 : index
    %43 = vector.load %arg10[%c0_19, %c0_20] : memref<16x1xf32, #tpu.memory_space<vmem>>, vector<16x1xf32>
    %44 = arith.extui %36 : vector<16x300xi1> to vector<16x300xi32>
    %45 = arith.sitofp %44 : vector<16x300xi32> to vector<16x300xf32>
    %cst_21 = arith.constant dense<0.000000e+00> : vector<16xf32>
    %46 = vector.multi_reduction <add>, %45, %cst_21 [1] : vector<16x300xf32> to vector<16xf32>
    %47 = vector.shape_cast %46 : vector<16xf32> to vector<16x1xf32>
    %48 = arith.addf %43, %47 : vector<16x1xf32>
    %c0_22 = arith.constant 0 : index
    %c0_23 = arith.constant 0 : index
    %49 = vector.load %arg10[%c0_22, %c0_23] : memref<16x1xf32, #tpu.memory_space<vmem>>, vector<16x1xf32>
    tpu.vector_store %arg10[%c0_22, %c0_23], %48 {strides = array<i32>} : memref<16x1xf32, #tpu.memory_space<vmem>>, vector<16x1xf32>,
    %c0_i32_24 = arith.constant 0 : i32
    %50 = arith.cmpi eq, %arg1, %c0_i32_24 : i32
    %51 = arith.extui %50 : i1 to i32
    %c0_i32_25 = arith.constant 0 : i32
    %52 = arith.cmpi ne, %51, %c0_i32_25 : i32
    scf.if %52 {
      %c0_26 = arith.constant 0 : index
      %53 = memref.load %arg3[%c0_26] : memref<1xf32, #tpu.memory_space<smem>>
      %cst_27 = arith.constant 1.000000e+00 : f32
      %54 = arith.divf %cst_27, %3 : f32
      %c0_28 = arith.constant 0 : index
      %c0_29 = arith.constant 0 : index
      %55 = vector.load %arg10[%c0_28, %c0_29] : memref<16x1xf32, #tpu.memory_space<vmem>>, vector<16x1xf32>
      %cst_30 = arith.constant 1.000000e+00 : f32
      %56 = vector.broadcast %cst_30 : f32 to vector<16x1xf32>
      %57 = arith.maximumf %55, %56 : vector<16x1xf32>
      %58 = math.log %57 : vector<16x1xf32>
      %c0_31 = arith.constant 0 : index
      %c0_32 = arith.constant 0 : index
      %59 = vector.load %arg9[%c0_31, %c0_32] : memref<1x128xf32, #tpu.memory_space<vmem>>, vector<1x128xf32>
      %c0_33 = arith.constant 0 : index
      %c0_34 = arith.constant 0 : index
      %60 = vector.load %arg8[%c0_33, %c0_34] : memref<16x128xf32, #tpu.memory_space<vmem>>, vector<16x128xf32>
      %61 = arith.subf %53, %54 : f32
      %62 = vector.broadcast %61 : f32 to vector<16x1xf32>
      %63 = arith.mulf %62, %58 : vector<16x1xf32>
      %64 = math.log %60 : vector<16x128xf32>
      %65 = vector.broadcast %59 : vector<1x128xf32> to vector<16x128xf32>
      %66 = arith.addf %65, %64 : vector<16x128xf32>
      %67 = vector.broadcast %54 : f32 to vector<16x128xf32>
      %68 = arith.mulf %67, %66 : vector<16x128xf32>
      %69 = vector.broadcast %63 : vector<16x1xf32> to vector<16x128xf32>
      %70 = arith.addf %69, %68 : vector<16x128xf32>
      %71 = math.exp %70 : vector<16x128xf32>
      %c0_35 = arith.constant 0 : index
      %c0_36 = arith.constant 0 : index
      %72 = vector.load %arg7[%c0_35, %c0_36] : memref<16x128xf32, #tpu.memory_space<vmem>>, vector<16x128xf32>
      tpu.vector_store %arg7[%c0_35, %c0_36], %71 {strides = array<i32>} : memref<16x128xf32, #tpu.memory_space<vmem>>, vector<16x128xf32>,
    } else {
    }
    return
  }
  func.func @transform_0(%arg0: i32, %arg1: i32) -> i32 {
    %c0_i32 = arith.constant 0 : i32
    %c0_i32_0 = arith.constant 0 : i32
    return %c0_i32 : i32
  }
  func.func @transform_1(%arg0: i32, %arg1: i32) -> i32 {
    %c0_i32 = arith.constant 0 : i32
    %c0_i32_0 = arith.constant 0 : i32
    return %c0_i32 : i32
  }
  func.func @transform_2(%arg0: i32, %arg1: i32) -> i32 {
    %c0_i32 = arith.constant 0 : i32
    %c0_i32_0 = arith.constant 0 : i32
    return %c0_i32 : i32
  }
  func.func @transform_3(%arg0: i32, %arg1: i32) -> (i32, i32) {
    %c0_i32 = arith.constant 0 : i32
    %c0_i32_0 = arith.constant 0 : i32
    return %c0_i32, %arg1 : i32, i32
  }
  func.func @transform_4(%arg0: i32, %arg1: i32) -> (i32, i32) {
    %c0_i32 = arith.constant 0 : i32
    return %arg1, %arg0 : i32, i32
  }
  func.func @transform_5(%arg0: i32, %arg1: i32) -> (i32, i32) {
    %c0_i32 = arith.constant 0 : i32
    %c0_i32_0 = arith.constant 0 : i32
    return %c0_i32, %arg0 : i32, i32
  }
}

</mosaic_0001>

<bundles_post_ra>
// kernel: tpu_custom_call.1
= control target key start
LH: loop header
LB: loop body
LE: loop exit
PB: predicated region body
PF: predicated region fallthrough
CT: control target
= control target key end

     0   :  { %s2806_s0 = inlined_call_operand.<no memory space> [shape: f32[1], index: 0, kind: input, shape index: {}]   ;;  %s2807_s1 = inlined_call_operand.<no memory space> [shape: f32[1], index: 1, kind: input, shape index: {}]   ;;  %s2808_s2 = inlined_call_operand.<no memory space> [shape: s32[1], index: 2, kind: input, shape index: {}]   ;;  %s2809_s3 = inlined_call_operand.vmem [shape: s32[1,300], index: 3, kind: input, shape index: {}]   ;;  %s2810_s4 = inlined_call_operand.hbm [shape: f32[300,256], index: 4, kind: input, shape index: {}]   ;;  %s2811_s5 = inlined_call_operand.hbm [shape: f32[16,256], index: 5, kind: output, shape index: {}]  }
   0x1   :  { %10 = sst [smem:[#allocation5]] %s2806_s0 }
   0x2   :  { %11 = sst [smem:[#allocation6]] %s2807_s1 }
   0x3   :  { %12 = sst [smem:[#allocation7]] %s2808_s2 }
   0x4   :  { %13 = vsyncpa [#allocation9], 0 }
   0x5   :  { %15 = vsyncpa [#allocation9 + $0x1], 0 }
   0x6   :  { %16 = vsyncpa [#allocation10], 0 }
   0x7   :  { %18 = vsyncpa [#allocation10 + $0x1], 0  ;;  %s1825_s24 = smov 0   ;;  %s1827_s25 = smov 0  }
   0x8   :  { %s1829_s26 = smov 0   ;;  %s1831_s27 = smov 0  }
   0x9   :  { %s1833_s0 = smov 0   ;;  %s1835_s28 = smov 0  }
   0xa LB: > { %s1281_s1 = sadd.s32 4294967295, %s1771_s28   ;;  %s1282_s2 = sadd.s32 4294967294, %s1771_s28   ;;  %s1771_s28 = sphi %s1835_s28, %s24_s28   ;;  %s1767_s0 = sphi %s1833_s0, %s2952_s0   ;;  %s1763_s27 = sphi %s1831_s27, %s2951_s27   ;;  %s1759_s26 = sphi %s1829_s26, %s2950_s26   ;;  %s1755_s25 = sphi %s1827_s25, %s2949_s25   ;;  %s1751_s24 = sphi %s1825_s24, %s2948_s24  }
   0xb   : > { %s36_s29 = sadd.s32 1, %s1767_s0  ;;  %s134_s30 = sadd.s32 1, %s1759_s26 }
   0xc   : > { %p38_p0 = scmp.ge.s32.totalorder %s36_s29, 2  ;;  %p141_p1 = scmp.ne.s32.totalorder %s1759_s26, %s1755_s25 }
   0xd   : > { %p142_p2 = scmp.eq.s32.totalorder %s1771_s28, 0  ;;  %p147_p3 = scmp.ne.s32.totalorder %s1755_s25, %s1751_s24 }
   0xe   : > { %s2954_s29 = smov (%p38_p0, %s36_s29), 0  ;;  %p148_p5 = scmp.eq.s32.totalorder %s1281_s1, 0 }
   0xf   : > { %p1866_p4 = por %p142_p2, %p141_p1  ;;  %s130_s7 = ssub.s32 %s1767_s0, %s2954_s29 }
  0x10   : > { %p171_p6 = scmp.eq.s32.totalorder %s1281_s1, 1  ;;  %p132_p7 = scmp.eq.s32.totalorder %s130_s7, 0 }
  0x11   : > { %p1872_p8 = por %p148_p5, %p147_p3  ;;  %p177_p10 = scmp.eq.s32.totalorder %s1282_s2, 1 }
  0x12   : > { %p1876_p9 = por %p171_p6, %p141_p1  ;;  %p1430_p13 = scmp.lt.s32.totalorder %s1771_s28, 2 }
  0x13   : > { %s1881_s10 = scalar_select %p132_p7, %s1759_s26, %s134_s30  }
  0x14   : > { %s2849_s9 = scalar_select %p1876_p9, 1, 0 }
  0x15   : > { %p1883_p11 = por %p177_p10, %p147_p3  ;;  %s214_s12 = sand.u32 1, %s1759_s26  }
  0x16   : > { %s1414_s13 = smul.u32 304, %s214_s12  ;;  %s1286_s14 = sshll.u32 %s1767_s0, 7 }
  0x17   : > { %s2850_s11 = scalar_select %p1883_p11, 1, 0 }
  0x18   : > { %p1893_p0 = pnand %p1430_p13, %p1866_p4  ;;  %s1900_s18 = scalar_lea.hbm %s2810_s4, %s1286_s14 }
  0x19   : > { %s218_s19 = scalar_lea.vmem [#allocation8], %s1414_s13  ;;  %s1904_s21 = scalar_lea.sflag [#allocation9], %s214_s12 }
  0x1a   : > { %s227_s20 = sshll.u32 %s218_s19, 4  ;;  %s1659_s22 = scalar_lea.hbm %s1900_s18, 4864  ;;  %s1902_s20 = int_to_ptr.vmem [resolvable:$true] %s227_s20 }
  0x1b   : > { %p1660_p1 = scmp.ne.s32.totalorder %s1900_s18, %s1659_s22  ;;  %p1661_p2 = pneg %p1893_p0 }
  0x1c   : > { %s1664_s2 = scalar_lea.hbm %s2810_s4, 9728  ;;  %p1665_p5 = scmp.lt.u32.totalorder %s1900_s18, %s2810_s4 }
  0x1d   : > { %p1662_p3 = pnand %p1661_p2, %p1660_p1  ;;  %p1666_p6 = scmp.lt.u32.totalorder %s1664_s2, %s1659_s22 }
  0x1e   : > { %p1668_p10 = scmp.lt.u32.totalorder %s1659_s22, %s1900_s18 }
  0x1f   : > { %p1663_p4 = pneg %p1662_p3  ;;  %p1667_p7 = por %p1666_p6, %p1665_p5 }
  0x21   : > { %p1669_p13 = por %p1668_p10, %p1667_p7 }
  0x23   : > { %p1670_p12 = pnand %p1669_p13, %p1663_p4 }
  0x25   : > { %1673 = shalt.err (!%p1670_p12)
}
  0x26   : > { %s1674_s7 = scalar_lea.vmem %s1902_s20, 4864  ;;  %s1773_s12 = smov [#allocation8]  }
  0x27   : > { %p1675_p1 = scmp.ne.s32.totalorder %s1902_s20, %s1674_s7  ;;  %s1679_s13 = sshll.u32 %s1773_s12, 4  ;;  %s1680_s13 = int_to_ptr.vmem [resolvable:$false] %s1679_s13 }
  0x28   : > { %s1681_s14 = scalar_lea.vmem %s1680_s13, 9728  ;;  %p1682_p9 = scmp.lt.s32.totalorder %s1902_s20, %s1680_s13 }
  0x29   : > { %p1677_p3 = pnand %p1675_p1, %p1661_p2  ;;  %p1683_p5 = scmp.lt.s32.totalorder %s1681_s14, %s1674_s7 }
  0x2b   : > { %p1678_p11 = pneg %p1677_p3  ;;  %p1684_p6 = por %p1683_p5, %p1682_p9 }
  0x2d   : > { %p1685_p7 = pnand %p1684_p6, %p1678_p11 }
  0x2f   : > { %1688 = shalt.err (!%p1685_p7)
}
  0x30   : > { %s1774_s16 = smov 256   ;;  %s1775_s17 = smov 128  }
  0x31   : > { %s1776_s19 = smov 8   ;;  %p1287_p12 = scmp.ge.s32.totalorder %s1771_s28, 1 }
  0x32   : > { %1425 = dma.hbm_to_vmem [thread:$0]  (!%p1893_p0), %s1900_s18, 4864, %s1902_s20, %s1904_s21, %s1774_s16, %s1775_s17, %s1776_s19  }
  0x33   : > { %p235_p2 = scmp.lt.s32.totalorder %s1771_s28, 3 }
  0x35   : > { %p236_p4 = pnand %p1287_p12, %p235_p2 }
  0x37   : > { %239 = sbr.rel (%p236_p4) target bundleno = 501 (0x1f5), region = 40 }
  0x3e   : > { %s1935_s22 = sand.u32 1, %s1755_s25  }
  0x3f   : > { %s1415_s23 = smul.u32 304, %s1935_s22  ;;  %s242_s1 = scalar_lea.sflag [#allocation9], %s1935_s22 }
  0x41   : > { %s1939_s2 = scalar_lea.vmem [#allocation8], %s1415_s23 }
  0x42   : > { %1742 = dma.done.wait (%p1872_p8), %s242_s1, 4864  }
  0x43   : > { %1744 = vsyncadd (%p1872_p8), %s242_s1, 4294962432  ;;  %v1777_v0 = vmov -1e+30   ;;  %v485_v1 = vlaneseq  ;;  %v293_v3 = vld [vmem:[%s1939_s2] sm:$0xff]  ;;  %vm2841_vm0 = vcmask 359424   ;;  %v294_v5 = vld [vmem:[%s1939_s2 + $0x8] sm:$0xff] }
  0x44   : > { %291 = vst [vmem:[#allocation3] sm:$0x1] %v1777_v0  ;;  %v904_v4 = vld [vmem:[%s2809_s3] sm:$0x7]  ;;  %v331_v15 = vand.u32 2147483647, %v293_v3 }
  0x45   : > { %v1945_v2 = vshrl.u32 %v485_v1, 7  ;;  %v295_v10 = vld [vmem:[%s1939_s2 + $0x10] sm:$0xff]  ;;  %v296_v14 = vld [vmem:[%s1939_s2 + $0x18] sm:$0xff]  ;;  %v332_v19 = vand.u32 2147483647, %v294_v5  ;;  %v297_v22 = vld [vmem:[%s1939_s2 + $0x20] sm:$0xff] }
  0x46   : > { %v333_v23 = vand.u32 2147483647, %v295_v10  ;;  %1493 = vlog2.f32 %v331_v15  ;;  %v298_v24 = vld [vmem:[%s1939_s2 + $0x28] sm:$0xff]  ;;  %v334_v25 = vand.u32 2147483647, %v296_v14  ;;  %v2814_v26 = vmov 0.0  }
  0x47   : > { %2852 = vst [vmem:[#allocation14_spill] sm:$0xff] %v1945_v2  ;;  %v1953_v6 = vadd.s32 8, %v1945_v2  ;;  %v2813_v7 = vsub.s32 0, %v1945_v2  ;;  %v911_v8 = vsub.s32 1, %v1945_v2  ;;  %v915_v9 = vsub.s32 2, %v1945_v2  ;;  %v299_v30 = vld [vmem:[%s1939_s2 + $0x30] sm:$0xff] }
  0x48   : > { %v1960_v11 = vadd.s32 16, %v1945_v2  ;;  %v1963_v12 = vadd.s32 24, %v1945_v2  ;;  %v1966_v13 = vadd.s32 32, %v1945_v2  ;;  %v1978_v20 = vadd.s32 40, %v1945_v2  ;;  %s2002_s8 = sld [smem:[#allocation5]]  ;;  %v300_v33 = vld [vmem:[%s1939_s2 + $0x38] sm:$0xff] }
  0x49   : > { %v1971_v16 = vrot.slane %v904_v4, %v2813_v7  ;;  %v1973_v17 = vrot.slane %v904_v4, %v911_v8  ;;  %v1975_v18 = vrot.slane %v904_v4, %v915_v9  ;;  %v1981_v21 = vadd.s32 48, %v1945_v2  ;;  %v301_v36 = vld [vmem:[%s1939_s2 + $0x40] sm:$0xff]  ;;  %v302_v37 = vld [vmem:[%s1939_s2 + $0x48] sm:$0xff]  ;;  %v303_v38 = vld [vmem:[%s1939_s2 + $0x50] sm:$0xff]  ;;  %s2016_s20 = sld [smem:[#allocation7]]  ;;  %s1288_s7 = sshll.u32 %s1935_s22, 4 }
  0x4a   : > { %1495 = vlog2.f32 %v332_v19  ;;  %v335_v34 = vand.u32 2147483647, %v297_v22  ;;  %v2007_v35 = vadd.s32 56, %v1945_v2  ;;  %v336_v39 = vand.u32 2147483647, %v298_v24  ;;  %v304_v42 = vld [vmem:[%s1939_s2 + $0x58] sm:$0xff] }
  0x4b   : > { %2853 = vst [vmem:[#allocation15_spill] sm:$0xff] %v1971_v16  ;;  %2854 = vst [vmem:[#allocation16_spill] sm:$0xff] %v1973_v17  ;;  %vm2839_vm1 = vcmp.eq.s32.totalorder %v1945_v2, %v1971_v16  ;;  %vm2840_vm2 = vcmp.eq.s32.totalorder %v1945_v2, %v1973_v17  ;;  %vm919_vm3 = vcmp.eq.s32.totalorder %v1945_v2, %v1975_v18  ;;  %1497 = vlog2.f32 %v333_v23  ;;  %v305_v46 = vld [vmem:[%s1939_s2 + $0x60] sm:$0xff]  ;;  %v306_v47 = vld [vmem:[%s1939_s2 + $0x68] sm:$0xff]  ;;  %s1121_s21 = sld [smem:[#allocation6]]  ;;  %s1304_s12 = sshll.u32 %s1763_s27, 7 }
  0x4c   : > { %2855 = vst [vmem:[#allocation17_spill] sm:$0xff] %v1975_v18  ;;  %v1289_v27 = vsel %vm2839_vm1, 1.0, %v2814_v26  ;;  %v1290_v28 = vsel %vm2840_vm2, 1.0, %v2814_v26  ;;  %v1291_v29 = vsel %vm919_vm3, 1.0, %v2814_v26  ;;  %1499 = vlog2.f32 %v334_v25  ;;  %v307_v54 = vld [vmem:[%s1939_s2 + $0x70] sm:$0xff]  ;;  %v308_v58 = vld [vmem:[%s1939_s2 + $0x78] sm:$0xff]  ;;  %s2755_s19 = scalar_lea.hbm %s2811_s5, %s1304_s12 }
  0x4d   : > { %v1103_v31 = vadd.f32 %v1290_v28, %v1289_v27  ;;  %v1104_v32 = vsel %vm2841_vm0, %v1291_v29, 0.0  ;;  %1365 = vmatprep.mubr.msk.f32.mxu1 %vm2841_vm0, %v1291_v29  ;;  %v2013_v40 = vadd.s32 64, %v1945_v2  ;;  %v337_v43 = vand.u32 2147483647, %v299_v30  ;;  %v309_v63 = vld [vmem:[%s1939_s2 + $0x80] sm:$0xff]  ;;  %v310_v4 = vld [vmem:[%s1939_s2 + $0x88] sm:$0xff] }
  0x4e   : > { %1501 = vlog2.f32 %v335_v34  ;;  %v2019_v44 = vadd.s32 72, %v1945_v2  ;;  %v2022_v45 = vadd.s32 80, %v1945_v2  ;;  %v338_v48 = vand.u32 2147483647, %v300_v33  ;;  %v311_v14 = vld [vmem:[%s1939_s2 + $0x90] sm:$0xff]  ;;  %v312_v24 = vld [vmem:[%s1939_s2 + $0x98] sm:$0xff] }
  0x4f   : > { %v1105_v41 = vadd.f32 %v1104_v32, %v1103_v31  ;;  %1503 = vlog2.f32 %v336_v39  ;;  %v339_v49 = vand.u32 2147483647, %v301_v36  ;;  %v340_v50 = vand.u32 2147483647, %v302_v37  ;;  %v313_v30 = vld [vmem:[%s1939_s2 + $0xa0] sm:$0xff]  ;;  %v314_v36 = vld [vmem:[%s1939_s2 + $0xa8] sm:$0xff] }
  0x50   : > { %v341_v51 = vand.u32 2147483647, %v303_v38  ;;  %1505 = vlog2.f32 %v337_v43  ;;  %v2027_v52 = vadd.s32 88, %v1945_v2  ;;  %v2030_v53 = vadd.s32 96, %v1945_v2  ;;  %v2040_v60 = vpop.eup %1493  ;;  %v324_v18 = vld [vmem:[%s1939_s2 + $0xf8] sm:$0xff]  ;;  %s275_s13 = scalar_lea.vmem [#allocation11], %s1288_s7 }
  0x51   : > { %1106 = vadd.xlane.f32.xlu0 %v1105_v41  ;;  %v342_v55 = vand.u32 2147483647, %v304_v42  ;;  %1507 = vlog2.f32 %v338_v48  ;;  %v2034_v56 = vadd.s32 104, %v1945_v2  ;;  %v2037_v57 = vadd.s32 112, %v1945_v2  ;;  %v315_v42 = vld [vmem:[%s1939_s2 + $0xb0] sm:$0xff]  ;;  %s1186_s14 = sshll.u32 %s275_s13, 4  ;;  %s2757_s14 = int_to_ptr.vmem [resolvable:$true] %s1186_s14 }
  0x52   : > { %v343_v59 = vand.u32 2147483647, %v305_v46  ;;  %1509 = vlog2.f32 %v339_v49  ;;  %v2043_v61 = vadd.s32 120, %v1945_v2  ;;  %v2046_v62 = vadd.s32 128, %v1945_v2  ;;  %v316_v49 = vld [vmem:[%s1939_s2 + $0xb8] sm:$0xff]  ;;  %s1174_s23 = scalar_lea.sflag [#allocation10], %s1935_s22 }
  0x53   : > { %v344_v0 = vand.u32 2147483647, %v306_v47  ;;  %1511 = vlog2.f32 %v340_v50  ;;  %v2050_v1 = vadd.s32 136, %v1945_v2  ;;  %v2053_v3 = vadd.s32 144, %v1945_v2  ;;  %s1689_s1 = scalar_lea.vmem %s2757_s14, 256  ;;  %p2945_p9 = scmp.ne.s32.totalorder %s2849_s9, 0 }
  0x54   : > { %v345_v5 = vand.u32 2147483647, %v307_v54  ;;  %1513 = vlog2.f32 %v341_v51  ;;  %v2056_v8 = vpop.eup %1495  ;;  %v2059_v9 = vadd.s32 152, %v1945_v2  ;;  %v2062_v10 = vadd.s32 160, %v1945_v2  ;;  %p1690_p8 = scmp.ne.s32.totalorder %s2757_s14, %s1689_s1  ;;  %s1782_s27 = smov [#allocation11]  }
  0x55   : > { %v346_v15 = vand.u32 2147483647, %v308_v58  ;;  %1515 = vlog2.f32 %v342_v55  ;;  %v2065_v19 = vpop.eup %1497  ;;  %v2068_v22 = vadd.s32 168, %v1945_v2  ;;  %v2071_v23 = vadd.s32 176, %v1945_v2  ;;  %v317_v58 = vld [vmem:[%s1939_s2 + $0xc0] sm:$0xff] }
  0x56   : > { %2856 = vst [vmem:[#allocation18_spill] sm:$0xff] %v2062_v10  ;;  %v347_v25 = vand.u32 2147483647, %v309_v63  ;;  %1517 = vlog2.f32 %v343_v59  ;;  %v2074_v27 = vpop.eup %1499  ;;  %v2077_v28 = vadd.s32 184, %v1945_v2  ;;  %v2080_v29 = vadd.s32 192, %v1945_v2  ;;  %p1691_p11 = pnand %p1690_p8, %p2945_p9 }
  0x57   : > { %2857 = vst [vmem:[#allocation19_spill] sm:$0xff] %v2068_v22  ;;  %2858 = vst [vmem:[#allocation20_spill] sm:$0xff] %v2071_v23  ;;  %v348_v31 = vand.u32 2147483647, %v310_v4  ;;  %1519 = vlog2.f32 %v344_v0  ;;  %v2086_v33 = vadd.s32 200, %v1945_v2  ;;  %v2089_v34 = vadd.s32 208, %v1945_v2 }
  0x58   : > { %2859 = vst [vmem:[#allocation21_spill] sm:$0xff] %v2077_v28  ;;  %2860 = vst [vmem:[#allocation22_spill] sm:$0xff] %v2080_v29  ;;  %v2083_v32 = vpop.eup %1501  ;;  %v349_v37 = vand.u32 2147483647, %v311_v14  ;;  %1521 = vlog2.f32 %v345_v5  ;;  %v2095_v39 = vadd.s32 216, %v1945_v2  ;;  %v2098_v41 = vadd.s32 224, %v1945_v2  ;;  %p1692_p0 = pneg %p1691_p11 }
  0x59   : > { %2861 = vst [vmem:[#allocation23_spill] sm:$0xff] %v2086_v33  ;;  %2862 = vst [vmem:[#allocation24_spill] sm:$0xff] %v2089_v34  ;;  %v2092_v38 = vpop.eup %1503  ;;  %v350_v43 = vand.u32 2147483647, %v312_v24  ;;  %1523 = vlog2.f32 %v346_v15  ;;  %v2104_v47 = vadd.s32 232, %v1945_v2  ;;  %v2107_v48 = vadd.s32 240, %v1945_v2 }
  0x5a   : > { %2863 = vst [vmem:[#allocation25_spill] sm:$0xff] %v2095_v39  ;;  %2864 = vst [vmem:[#allocation26_spill] sm:$0xff] %v2098_v41  ;;  %v2101_v46 = vpop.eup %1505  ;;  %v351_v50 = vand.u32 2147483647, %v313_v30  ;;  %1525 = vlog2.f32 %v347_v25  ;;  %v2113_v54 = vadd.s32 248, %v1945_v2  ;;  %v2116_v55 = vadd.s32 256, %v1945_v2 }
  0x5b   : > { %2865 = vst [vmem:[#allocation27_spill] sm:$0xff] %v2104_v47  ;;  %2866 = vst [vmem:[#allocation28_spill] sm:$0xff] %v2107_v48  ;;  %v2110_v51 = vpop.eup %1507  ;;  %v352_v59 = vand.u32 2147483647, %v314_v36  ;;  %1527 = vlog2.f32 %v348_v31  ;;  %v2122_v0 = vadd.s32 264, %v1945_v2  ;;  %v2125_v4 = vadd.s32 272, %v1945_v2 }
  0x5c   : > { %2867 = vst [vmem:[#allocation29_spill] sm:$0xff] %v2113_v54  ;;  %2868 = vst [vmem:[#allocation30_spill] sm:$0xff] %v2116_v55  ;;  %v2119_v63 = vpop.eup %1509  ;;  %v318_v5 = vld [vmem:[%s1939_s2 + $0xc8] sm:$0xff]  ;;  %v353_v14 = vand.u32 2147483647, %v315_v42  ;;  %1529 = vlog2.f32 %v349_v37  ;;  %v2131_v24 = vadd.s32 280, %v1945_v2  ;;  %v2165_v47 = vstv %s2016_s20 }
  0x5d   : > { %2869 = vst [vmem:[#allocation31_spill] sm:$0xff] %v2122_v0  ;;  %2870 = vst [vmem:[#allocation32_spill] sm:$0xff] %v2125_v4  ;;  %v2128_v15 = vpop.eup %1511  ;;  %v319_v25 = vld [vmem:[%s1939_s2 + $0xd0] sm:$0xff]  ;;  %v320_v30 = vld [vmem:[%s1939_s2 + $0xd8] sm:$0xff]  ;;  %v354_v36 = vand.u32 2147483647, %v316_v49  ;;  %1531 = vlog2.f32 %v350_v43  ;;  %vm565_vm4 = vcmp.lt.s32.totalorder %v1945_v2, %v2165_v47  ;;  %vm566_vm5 = vcmp.lt.s32.totalorder %v1953_v6, %v2165_v47 }
  0x5e   : > { %2871 = vst [vmem:[#allocation33_spill] sm:$0xff] %v2131_v24  ;;  %v321_v31 = vld [vmem:[%s1939_s2 + $0xe0] sm:$0xff]  ;;  %v1514_v7 = vpop.eup %1513  ;;  %v2137_v26 = vadd.s32 288, %v1945_v2  ;;  %v322_v37 = vld [vmem:[%s1939_s2 + $0xe8] sm:$0xff]  ;;  %v323_v42 = vld [vmem:[%s1939_s2 + $0xf0] sm:$0xff]  ;;  %1533 = vlog2.f32 %v351_v50  ;;  %v2143_v24 = vadd.s32 296, %v1945_v2  ;;  %vm569_vm6 = vcmp.lt.s32.totalorder %v1966_v13, %v2165_v47 }
  0x5f   : > { %v355_v17 = vand.u32 2147483647, %v317_v58  ;;  %v1516_v16 = vpop.eup %1515  ;;  %v325_v49 = vld [vmem:[%s1939_s2 + $0x100] sm:$0xff]  ;;  %v2147_v4 = vld [vmem:[%s1939_s2 + $0x108] sm:$0xff]  ;;  %v2150_v43 = vld [vmem:[%s1939_s2 + $0x110] sm:$0xff]  ;;  %1535 = vlog2.f32 %v352_v59  ;;  %vm570_vm7 = vcmp.lt.s32.totalorder %v1978_v20, %v2165_v47  ;;  %vm567_vm8 = vcmp.lt.s32.totalorder %v1960_v11, %v2165_v47 }
  0x60   : > { %2872 = vst [vmem:[#allocation34_spill] sm:$0xff] %v2137_v26  ;;  %2873 = vst [vmem:[#allocation35_spill] sm:$0xff] %v2143_v24  ;;  %v356_v0 = vand.u32 2147483647, %v318_v5  ;;  %v2153_v26 = vstv %s2002_s8  ;;  %v1518_v55 = vpop.eup %1517  ;;  %v2156_v54 = vld [vmem:[%s1939_s2 + $0x118] sm:$0xff]  ;;  %v2159_v48 = vld [vmem:[%s1939_s2 + $0x120] sm:$0xff]  ;;  %1537 = vlog2.f32 %v353_v14  ;;  %vm571_vm9 = vcmp.lt.s32.totalorder %v1981_v21, %v2165_v47 }
  0x61   : > { %v2162_v58 = vld [vmem:[%s1939_s2 + $0x128] sm:$0xf]  ;;  %v357_v50 = vand.u32 2147483647, %v319_v25  ;;  %v1520_v24 = vpop.eup %1519  ;;  %v358_v41 = vand.u32 2147483647, %v320_v30  ;;  %1539 = vlog2.f32 %v354_v36  ;;  %vm568_vm10 = vcmp.lt.s32.totalorder %v1963_v12, %v2165_v47 }
  0x62   : > { %v359_v39 = vand.u32 2147483647, %v321_v31  ;;  %v360_v34 = vand.u32 2147483647, %v322_v37  ;;  %v1522_v5 = vpop.eup %1521  ;;  %v361_v59 = vand.u32 2147483647, %v323_v42  ;;  %1541 = vlog2.f32 %v355_v17 }
  0x63   : > { %v362_v33 = vand.u32 2147483647, %v324_v18  ;;  %v363_v29 = vand.u32 2147483647, %v325_v49  ;;  %v1524_v28 = vpop.eup %1523  ;;  %v364_v23 = vand.u32 2147483647, %v2147_v4  ;;  %1543 = vlog2.f32 %v356_v0 }
  0x64   : > { %v365_v22 = vand.u32 2147483647, %v2150_v43  ;;  %v370_v25 = vmul.f32 0.6931472, %v2040_v60  ;;  %v1526_v14 = vpop.eup %1525  ;;  %v366_v10 = vand.u32 2147483647, %v2156_v54  ;;  %1545 = vlog2.f32 %v357_v50 }
  0x65   : > { %v367_v30 = vand.u32 2147483647, %v2159_v48  ;;  %v372_v31 = vmul.f32 0.6931472, %v2056_v8  ;;  %v1528_v36 = vpop.eup %1527  ;;  %v368_v18 = vand.u32 2147483647, %v2162_v58  ;;  %1547 = vlog2.f32 %v358_v41 }
  0x66   : > { %v374_v17 = vmul.f32 0.6931472, %v2065_v19  ;;  %v376_v4 = vmul.f32 0.6931472, %v2074_v27  ;;  %v1530_v37 = vpop.eup %1529  ;;  %v378_v60 = vmul.f32 0.6931472, %v2083_v32  ;;  %1549 = vlog2.f32 %v359_v39 }
  0x67   : > { %v380_v0 = vmul.f32 0.6931472, %v2092_v38  ;;  %v382_v54 = vmul.f32 0.6931472, %v2101_v46  ;;  %v1532_v48 = vpop.eup %1531  ;;  %v384_v8 = vmul.f32 0.6931472, %v2110_v51  ;;  %1551 = vlog2.f32 %v360_v34 }
  0x68   : > { %v386_v42 = vmul.f32 0.6931472, %v2119_v63  ;;  %v2182_v49 = vmul.f32 %v2153_v26, %v370_v25  ;;  %v1534_v19 = vpop.eup %1533  ;;  %v388_v27 = vmul.f32 0.6931472, %v2128_v15  ;;  %v390_v41 = vmul.f32 0.6931472, %v1514_v7 }
  0x69   : > { %1553 = vlog2.f32 %v361_v59  ;;  %v2186_v32 = vmul.f32 %v2153_v26, %v372_v31  ;;  %v1536_v38 = vpop.eup %1535  ;;  %v392_v46 = vmul.f32 0.6931472, %v1516_v16  ;;  %v2189_v39 = vmul.f32 %v2153_v26, %v374_v17  ;;  %s1693_s2 = sshll.u32 %s1782_s27, 4  ;;  %s1694_s2 = int_to_ptr.vmem [resolvable:$false] %s1693_s2 }
  0x6a   : > { %1555 = vlog2.f32 %v362_v33  ;;  %v2192_v51 = vmul.f32 %v2153_v26, %v376_v4  ;;  %v1538_v34 = vpop.eup %1537  ;;  %v2195_v63 = vmul.f32 %v2153_v26, %v378_v60  ;;  %v2198_v7 = vmul.f32 %v2153_v26, %v380_v0  ;;  %s1695_s15 = scalar_lea.vmem %s1694_s2, 512  ;;  %p1696_p10 = scmp.lt.s32.totalorder %s2757_s14, %s1694_s2 }
  0x6b   : > { %1557 = vlog2.f32 %v363_v29  ;;  %v2201_v15 = vmul.f32 %v2153_v26, %v382_v54  ;;  %v1540_v43 = vpop.eup %1539  ;;  %v394_v16 = vmul.f32 0.6931472, %v1518_v55  ;;  %v2204_v33 = vmul.f32 %v2153_v26, %v384_v8  ;;  %p1697_p13 = scmp.lt.s32.totalorder %s1695_s15, %s1689_s1 }
  0x6c   : > { %1559 = vlog2.f32 %v364_v23  ;;  %v2207_v58 = vmul.f32 %v2153_v26, %v386_v42  ;;  %v1542_v50 = vpop.eup %1541  ;;  %v396_v29 = vmul.f32 0.6931472, %v1520_v24  ;;  %v2210_v59 = vmul.f32 %v2153_v26, %v388_v27 }
  0x6d   : > { %1561 = vlog2.f32 %v365_v22  ;;  %v2213_v25 = vmul.f32 %v2153_v26, %v390_v41  ;;  %v1544_v31 = vpop.eup %1543  ;;  %v398_v17 = vmul.f32 0.6931472, %v1522_v5  ;;  %v400_v4 = vmul.f32 0.6931472, %v1524_v28  ;;  %p1698_p1 = por %p1697_p13, %p1696_p10 }
  0x6e   : > { %1563 = vlog2.f32 %v366_v10  ;;  %v2216_v23 = vmul.f32 %v2153_v26, %v392_v46  ;;  %v1546_v55 = vpop.eup %1545  ;;  %v402_v60 = vmul.f32 0.6931472, %v1526_v14  ;;  %v404_v0 = vmul.f32 0.6931472, %v1528_v36 }
  0x6f   : > { %v406_v54 = vmul.f32 0.6931472, %v1530_v37  ;;  %1565 = vlog2.f32 %v367_v30  ;;  %v1548_v24 = vpop.eup %1547  ;;  %v408_v22 = vmul.f32 0.6931472, %v1532_v48  ;;  %v410_v8 = vmul.f32 0.6931472, %v1534_v19  ;;  %p1699_p3 = pnand %p1698_p1, %p1692_p0 }
  0x70   : > { %v412_v42 = vmul.f32 0.6931472, %v1536_v38  ;;  %1567 = vlog2.f32 %v368_v18  ;;  %v1550_v27 = vpop.eup %1549  ;;  %v414_v5 = vmul.f32 0.6931472, %v1538_v34  ;;  %v416_v28 = vmul.f32 0.6931472, %v1540_v43 }
  0x71   : > { %v2221_v10 = vmul.f32 %v2153_v26, %v394_v16  ;;  %v2224_v41 = vmul.f32 %v2153_v26, %v396_v29  ;;  %v1552_v14 = vpop.eup %1551  ;;  %v418_v30 = vmul.f32 0.6931472, %v1542_v50  ;;  %v420_v36 = vmul.f32 0.6931472, %v1544_v31 }
  0x72   : > { %v2233_v18 = vmul.f32 %v2153_v26, %v398_v17  ;;  %v2236_v37 = vmul.f32 %v2153_v26, %v400_v4  ;;  %v422_v19 = vmul.f32 0.6931472, %v1546_v55  ;;  %v2243_v38 = vmul.f32 %v2153_v26, %v402_v60 }
  0x73   : > { %v1554_v48 = vpop.eup %1553  ;;  %v2246_v46 = vmul.f32 %v2153_v26, %v404_v0  ;;  %v2249_v34 = vmul.f32 %v2153_v26, %v406_v54  ;;  %vm572_vm11 = vcmp.lt.s32.totalorder %v2007_v35, %v2165_v47  ;;  %v424_v16 = vmul.f32 0.6931472, %v1548_v24 }
  0x74   : > { %v1556_v43 = vpop.eup %1555  ;;  %v2256_v50 = vmul.f32 %v2153_v26, %v408_v22  ;;  %v2259_v29 = vmul.f32 %v2153_v26, %v410_v8  ;;  %v2262_v31 = vmul.f32 %v2153_v26, %v412_v42  ;;  %vm573_vm12 = vcmp.lt.s32.totalorder %v2013_v40, %v2165_v47 }
  0x75   : > { %vm574_vm13 = vcmp.lt.s32.totalorder %v2019_v44, %v2165_v47  ;;  %vm575_vm14 = vcmp.lt.s32.totalorder %v2022_v45, %v2165_v47  ;;  %v1558_v17 = vpop.eup %1557  ;;  %v426_v4 = vmul.f32 0.6931472, %v1550_v27  ;;  %v428_v55 = vmul.f32 0.6931472, %v1552_v14 }
  0x76   : > { %v2271_v60 = vmul.f32 %v2153_v26, %v414_v5  ;;  %v2274_v0 = vmul.f32 %v2153_v26, %v416_v28  ;;  %v1560_v54 = vpop.eup %1559  ;;  %v430_v24 = vmul.f32 0.6931472, %v1554_v48  ;;  %v432_v22 = vmul.f32 0.6931472, %v1556_v43  ;;  %v2880_v43 = vld [vmem:[#allocation18_spill] sm:$0xff] }
  0x77   : > { %v2283_v8 = vmul.f32 %v2153_v26, %v418_v30  ;;  %v2286_v42 = vmul.f32 %v2153_v26, %v420_v36  ;;  %v1562_v27 = vpop.eup %1561  ;;  %v434_v5 = vmul.f32 0.6931472, %v1558_v17  ;;  %v436_v28 = vmul.f32 0.6931472, %v1560_v54 }
  0x78   : > { %2874 = vst [vmem:[#allocation36_spill] sm:$0xff] %v2271_v60  ;;  %2875 = vst [vmem:[#allocation37_spill] sm:$0xff] %v2274_v0  ;;  %v2295_v14 = vmul.f32 %v2153_v26, %v422_v19  ;;  %v1564_v30 = vpop.eup %1563  ;;  %v438_v36 = vmul.f32 0.6931472, %v1562_v27  ;;  %v2304_v48 = vmul.f32 %v2153_v26, %v424_v16  ;;  %v2881_v19 = vld [vmem:[#allocation19_spill] sm:$0xff]  ;;  %v2885_v16 = vld [vmem:[#allocation21_spill] sm:$0xff]  ;;  %v476_v17 = vmul.f32 %v2153_v26, %v430_v24 }
  0x79   : > { %2876 = vst [vmem:[#allocation38_spill] sm:$0xff] %v2283_v8  ;;  %2877 = vst [vmem:[#allocation39_spill] sm:$0xff] %v2286_v42  ;;  %v1566_v54 = vpop.eup %1565  ;;  %v2313_v42 = vmul.f32 %v2153_v26, %v426_v4  ;;  %v2316_v8 = vmul.f32 %v2153_v26, %v428_v55  ;;  %v2888_v4 = vld [vmem:[#allocation24_spill] sm:$0xff]  ;;  %v2889_v55 = vld [vmem:[#allocation25_spill] sm:$0xff]  ;;  %v478_v27 = vmul.f32 %v2153_v26, %v434_v5  ;;  %v2381_v13 = vsel %vm567_vm8, %v2189_v39, -1e+30 }
  0x7a   : > { %2878 = vst [vmem:[#allocation40_spill] sm:$0xff] %v2295_v14  ;;  %2879 = vst [vmem:[#allocation41_spill] sm:$0xff] %v2304_v48  ;;  %v440_v14 = vmul.f32 0.6931472, %v1564_v30  ;;  %v1568_v0 = vpop.eup %1567  ;;  %v442_v60 = vmul.f32 0.6931472, %v1566_v54  ;;  %v477_v30 = vmul.f32 %v2153_v26, %v432_v22  ;;  %vm592_vm15 = vcmp.lt.s32.totalorder %v2889_v55, %v2165_v47 }
  0x7b   : > { %2883 = vst [vmem:[#allocation18_spill] sm:$0xff] %v2313_v42  ;;  %2884 = vst [vmem:[#allocation19_spill] sm:$0xff] %v2316_v8  ;;  %v2890_v8 = vld [vmem:[#allocation26_spill] sm:$0xff]  ;;  %v444_v42 = vmul.f32 0.6931472, %v1568_v0  ;;  %v479_v48 = vmul.f32 %v2153_v26, %v436_v28  ;;  %v2891_v54 = vld [vmem:[#allocation27_spill] sm:$0xff]  ;;  %v480_v0 = vmul.f32 %v2153_v26, %v438_v36  ;;  %1569 = vrcp.f32 %v2153_v26 }
  0x7c   : > { %v2892_v24 = vld [vmem:[#allocation28_spill] sm:$0xff]  ;;  %v2893_v22 = vld [vmem:[#allocation29_spill] sm:$0xff]  ;;  %v2344_v55 = vsel %vm565_vm4, %v2182_v49, -1e+30  ;;  %v2894_v5 = vld [vmem:[#allocation30_spill] sm:$0xff]  ;;  %v2370_v2 = vmul.f32 %v2153_v26, %v440_v14 }
  0x7d   : > { %vm595_vm3 = vcmp.lt.s32.totalorder %v2892_v24, %v2165_v47  ;;  %vm596_vm1 = vcmp.lt.s32.totalorder %v2893_v22, %v2165_v47  ;;  %vm597_vm2 = vcmp.lt.s32.totalorder %v2894_v5, %v2165_v47  ;;  %v2895_v28 = vld [vmem:[#allocation31_spill] sm:$0xff]  ;;  %v2355_v24 = vsel %vm566_vm5, %v2186_v32, -1e+30  ;;  %v2896_v32 = vld [vmem:[#allocation32_spill] sm:$0xff] }
  0x7e   : > { %vm598_vm0 = vcmp.lt.s32.totalorder %v2895_v28, %v2165_v47  ;;  %v2361_v49 = vsel %vm569_vm6, %v2195_v63, -1e+30  ;;  %v2367_v36 = vsel %vm570_vm7, %v2198_v7, -1e+30  ;;  %v2373_v28 = vmul.f32 %v2153_v26, %v442_v60 }
  0x7f   : > { %vm599_vm4 = vcmp.lt.s32.totalorder %v2896_v32, %v2165_v47  ;;  %v2387_v20 = vsel %vm571_vm9, %v2201_v15, -1e+30  ;;  %v483_v63 = vmul.f32 %v2153_v26, %v444_v42  ;;  %v2394_v7 = vsel %vm568_vm10, %v2192_v51, -1e+30 }
  0x80   : > { %v2400_v11 = vsel %vm572_vm11, %v2204_v33, -1e+30  ;;  %v718_v39 = vmax.f32 %v2344_v55, %v2361_v49  ;;  %v2408_v21 = vsel %vm573_vm12, %v2207_v58, -1e+30  ;;  %v2414_v12 = vsel %vm574_vm13, %v2210_v59, -1e+30 }
  0x81   : > { %v2420_v35 = vsel %vm575_vm14, %v2213_v25, -1e+30  ;;  %v719_v51 = vmax.f32 %v2355_v24, %v2367_v36  ;;  %vm2897_vm5 = vcmp.lt.s32.totalorder %v2027_v52, %v2165_v47  ;;  %vm2898_vm6 = vcmp.lt.s32.totalorder %v2030_v53, %v2165_v47  ;;  %v2900_v33 = vld [vmem:[#allocation35_spill] sm:$0xff]  ;;  %v2909_v25 = vld [vmem:[#allocation36_spill] sm:$0xff] }
  0x82   : > { %v2428_v40 = vsel %vm2897_vm5, %v2216_v23, -1e+30  ;;  %v2434_v44 = vsel %vm2898_vm6, %v2221_v10, -1e+30  ;;  %vm2899_vm7 = vcmp.lt.s32.totalorder %v2034_v56, %v2165_v47  ;;  %v720_v15 = vmax.f32 %v2381_v13, %v2387_v20  ;;  %v2910_v23 = vld [vmem:[#allocation20_spill] sm:$0xff] }
  0x83   : > { %v2440_v45 = vsel %vm2899_vm7, %v2224_v41, -1e+30  ;;  %vm602_vm8 = vcmp.lt.s32.totalorder %v2900_v33, %v2165_v47  ;;  %vm2901_vm9 = vcmp.lt.s32.totalorder %v2037_v57, %v2165_v47  ;;  %vm2902_vm10 = vcmp.lt.s32.totalorder %v2043_v61, %v2165_v47  ;;  %v2912_v41 = vld [vmem:[#allocation33_spill] sm:$0xff]  ;;  %v2922_v14 = vld [vmem:[#allocation40_spill] sm:$0xff] }
  0x84   : > { %v2450_v52 = vsel %vm2901_vm9, %v2233_v18, -1e+30  ;;  %v2456_v53 = vsel %vm2902_vm10, %v2236_v37, -1e+30  ;;  %vm2903_vm11 = vcmp.lt.s32.totalorder %v2046_v62, %v2165_v47  ;;  %v721_v58 = vmax.f32 %v2394_v7, %v2400_v11  ;;  %v2913_v18 = vld [vmem:[#allocation34_spill] sm:$0xff]  ;;  %v2914_v37 = vld [vmem:[#allocation37_spill] sm:$0xff] }
  0x85   : > { %v2462_v56 = vsel %vm2903_vm11, %v2243_v38, -1e+30  ;;  %vm2904_vm12 = vcmp.lt.s32.totalorder %v2050_v1, %v2165_v47  ;;  %vm2905_vm13 = vcmp.lt.s32.totalorder %v2053_v3, %v2165_v47  ;;  %vm2906_vm14 = vcmp.lt.s32.totalorder %v2059_v9, %v2165_v47 }
  0x86   : > { %v2470_v57 = vsel %vm2904_vm12, %v2246_v46, -1e+30  ;;  %v2476_v61 = vsel %vm2905_vm13, %v2249_v34, -1e+30  ;;  %v2482_v62 = vsel %vm2906_vm14, %v2256_v50, -1e+30  ;;  %v722_v59 = vmax.f32 %v718_v39, %v2408_v21 }
  0x87   : > { %vm2907_vm5 = vcmp.lt.s32.totalorder %v2880_v43, %v2165_v47  ;;  %vm2908_vm6 = vcmp.lt.s32.totalorder %v2881_v19, %v2165_v47  ;;  %vm2911_vm7 = vcmp.lt.s32.totalorder %v2910_v23, %v2165_v47  ;;  %v723_v10 = vmax.f32 %v719_v51, %v2414_v12  ;;  %v2916_v46 = vld [vmem:[#allocation38_spill] sm:$0xff]  ;;  %v2924_v19 = vld [vmem:[#allocation41_spill] sm:$0xff]  ;;  %v2928_v23 = vld [vmem:[#allocation19_spill] sm:$0xff] }
  0x88   : > { %v2489_v1 = vsel %vm2907_vm5, %v2259_v29, -1e+30  ;;  %v2495_v3 = vsel %vm2908_vm6, %v2262_v31, -1e+30  ;;  %v2501_v9 = vsel %vm2911_vm7, %v2909_v25, -1e+30  ;;  %vm600_vm9 = vcmp.lt.s32.totalorder %v2912_v41, %v2165_v47 }
  0x89   : > { %vm601_vm10 = vcmp.lt.s32.totalorder %v2913_v18, %v2165_v47  ;;  %vm2915_vm11 = vcmp.lt.s32.totalorder %v2885_v16, %v2165_v47  ;;  %v2917_v34 = vld [vmem:[#allocation22_spill] sm:$0xff]  ;;  %v2919_v29 = vld [vmem:[#allocation39_spill] sm:$0xff]  ;;  %v724_v42 = vmax.f32 %v720_v15, %v2420_v35  ;;  %vm751_vm14 = vcmask 1043456  }
  0x8a   : > { %v2512_v38 = vsel %vm2915_vm11, %v2914_v37, -1e+30  ;;  %vm2918_vm12 = vcmp.lt.s32.totalorder %v2917_v34, %v2165_v47  ;;  %v2920_v31 = vld [vmem:[#allocation23_spill] sm:$0xff]  ;;  %vm2923_vm5 = vcmp.lt.s32.totalorder %v2888_v4, %v2165_v47  ;;  %v2537_v39 = vsel %vm592_vm15, %v2924_v19, -1e+30  ;;  %v2926_v51 = vld [vmem:[#allocation18_spill] sm:$0xff] }
  0x8b   : > { %v2518_v50 = vsel %vm2918_vm12, %v2916_v46, -1e+30  ;;  %vm2921_vm13 = vcmp.lt.s32.totalorder %v2920_v31, %v2165_v47  ;;  %v2531_v43 = vsel %vm2923_vm5, %v2922_v14, -1e+30  ;;  %vm2927_vm6 = vcmp.lt.s32.totalorder %v2890_v8, %v2165_v47  ;;  %v2933_v14 = vld [vmem:[#allocation16_spill] sm:$0xff] }
  0x8c   : > { %v2524_v60 = vsel %vm2921_vm13, %v2919_v29, -1e+30  ;;  %v2543_v25 = vsel %vm2927_vm6, %v2926_v51, -1e+30  ;;  %v725_v15 = vmax.f32 %v721_v58, %v2428_v40  ;;  %vm2929_vm7 = vcmp.lt.s32.totalorder %v2891_v54, %v2165_v47 }
  0x8d   : > { %v2550_v4 = vsel %vm2929_vm7, %v2928_v23, -1e+30  ;;  %v2555_v46 = vsel %vm595_vm3, %v476_v17, -1e+30  ;;  %v2560_v34 = vsel %vm596_vm1, %v477_v30, -1e+30  ;;  %v726_v8 = vmax.f32 %v722_v59, %v2434_v44 }
  0x8e   : > { %v2566_v58 = vsel %vm597_vm2, %v478_v27, -1e+30  ;;  %v2571_v29 = vsel %vm598_vm0, %v479_v48, -1e+30  ;;  %v727_v17 = vmax.f32 %v723_v10, %v2440_v45  ;;  %v728_v31 = vmax.f32 %v724_v42, %v2450_v52  ;;  %v2932_v27 = vld [vmem:[#allocation15_spill] sm:$0xff]  ;;  %v2934_v10 = vld [vmem:[#allocation17_spill] sm:$0xff] }
  0x8f   : > { %v2578_v30 = vsel %vm599_vm4, %v480_v0, -1e+30  ;;  %v729_v22 = vmax.f32 %v725_v15, %v2456_v53  ;;  %v730_v5 = vmax.f32 %v726_v8, %v2462_v56  ;;  %vm920_vm1 = vcmp.eq.s32.totalorder %v1953_v6, %v2932_v27 }
  0x90   : > { %v731_v59 = vmax.f32 %v727_v17, %v2470_v57  ;;  %v732_v48 = vmax.f32 %v728_v31, %v2476_v61  ;;  %vm921_vm0 = vcmp.eq.s32.totalorder %v1953_v6, %v2933_v14  ;;  %vm922_vm2 = vcmp.eq.s32.totalorder %v1953_v6, %v2934_v10 }
  0x91   : > { %v733_v0 = vmax.f32 %v729_v22, %v2482_v62  ;;  %v734_v32 = vmax.f32 %v730_v5, %v2489_v1  ;;  %v2935_v42 = vmov 0.0   ;;  %v2608_v8 = vsel %vm602_vm8, %v483_v63, -1e+30  ;;  %v2938_v63 = vld [vmem:[#allocation14_spill] sm:$0xff] }
  0x92   : > { %v1292_v19 = vsel %vm920_vm1, 1.0, %v2935_v42  ;;  %v1293_v16 = vsel %vm921_vm0, 1.0, %v2935_v42  ;;  %v735_v51 = vmax.f32 %v731_v59, %v2495_v3  ;;  %v736_v15 = vmax.f32 %v732_v48, %v2501_v9 }
  0x93   : > { %v2603_v23 = vsel %vm922_vm2, 1.0, %v2935_v42  ;;  %v1108_v37 = vadd.f32 %v1293_v16, %v1292_v19  ;;  %v737_v54 = vmax.f32 %v733_v0, %v2512_v38  ;;  %v738_v17 = vmax.f32 %v734_v32, %v2518_v50 }
  0x94   : > { %2936 = vst [vmem:[#allocation21_spill] sm:$0xff] %v2603_v23  ;;  %vm2937_vm15 = vcmask 359424   ;;  %v739_v22 = vmax.f32 %v735_v51, %v2524_v60  ;;  %v740_v5 = vmax.f32 %v736_v15, %v2531_v43  ;;  %v2844_v19 = vmov 1.0  }
  0x95   : > { %v1109_v31 = vsel %vm2937_vm15, %v2603_v23, 0.0  ;;  %v741_v48 = vmax.f32 %v737_v54, %v2537_v39  ;;  %v742_v10 = vmax.f32 %v738_v17, %v2543_v25  ;;  %vm2939_vm3 = vcmp.eq.s32.totalorder %v2938_v63, %v2933_v14  ;;  %vm2944_vm11 = vmmov %vm2937_vm15 }
  0x96   : > { %v1110_v59 = vadd.f32 %v1109_v31, %v1108_v37  ;;  %1295 = vmatprep.mubr.msk.f32.mxu0 %vm2939_vm3, %v2844_v19  ;;  %vm288_vm4 = vcmask 7168   ;;  %v2627_v33 = vsel %vm600_vm9, %v2370_v2, -1e+30  ;;  %v2633_v0 = vsel %vm601_vm10, %v2373_v28, -1e+30 }
  0x97   : > { %v743_v32 = vmax.f32 %v739_v22, %v2550_v4  ;;  %v744_v16 = vmax.f32 %v740_v5, %v2555_v46  ;;  %289 = vst.msk [vmem:[#allocation4] sm:$0xff] %vm288_vm4, %v2935_v42  ;;  %290 = vst.msk [vmem:[#allocation4 + $0x8] sm:$0xff] %vm288_vm4, %v2935_v42  ;;  %v745_v2 = vmax.f32 %v741_v48, %v2560_v34  ;;  %v752_v47 = vsel %vm751_vm14, %v2608_v8, -inf  ;;  %v1570_v42 = vpop.eup %1569 }
  0x98   : > { %1111 = vadd.xlane.f32.xlu0 %v1110_v59  ;;  %v746_v26 = vmax.f32 %v742_v10, %v2566_v58  ;;  %1416 = vpush %v1570_v42  ;;  %v717_v10 = vld [vmem:[#allocation3] sm:$0x1]  ;;  %vm1781_vm8 = vmmov 1   ;;  %vm2942_vm10 = vcmp.eq.s32.totalorder %v2938_v63, %v2932_v27 }
  0x99   : > { %v747_v28 = vmax.f32 %v743_v32, %v2571_v29  ;;  %v748_v41 = vmax.f32 %v744_v16, %v2578_v30  ;;  %v749_v18 = vmax.f32 %v745_v2, %v2627_v33  ;;  %v2940_v16 = vsub.s32 0, %v2938_v63  ;;  %vm1409_vm9 = vmpackc.low %vm751_vm14, %vm1781_vm8 }
  0x9a   : > { %v750_v51 = vmax.f32 %v746_v26, %v2633_v0 }
  0x9b   : > { %v753_v15 = vmax.f32 %v747_v28, %v752_v47  ;;  %v755_v37 = vmax.f32 %v748_v41, %v749_v18 }
  0x9d   : > { %v754_v54 = vmax.f32 %v750_v51, %v753_v15 }
  0x9f   : > { %v756_v17 = vmax.f32 %v754_v54, %v755_v37 }
  0xa1   : > { %v757_v31 = vrot.slane %v756_v17, 4 }
  0xa3   : > { %v758_v22 = vmax.f32 %v756_v17, %v757_v31 }
  0xa5   : > { %v759_v5 = vrot.slane %v758_v22, 2 }
  0xa7   : > { %v760_v59 = vmax.f32 %v758_v22, %v759_v5 }
  0xa9   : > { %v761_v48 = vrot.slane %v760_v59, 1 }
  0xab   : > { %v762_v19 = vmax.f32 %v760_v59, %v761_v48 }
  0xad   : > { %v763_v32 = vmax.f32 %v717_v10, %v762_v19 }
  0xaf   : > { %v2651_v23 = vrot.slane %v763_v32, %v2940_v16  ;;  %764 = vst [vmem:[#allocation3] sm:$0x1] %v763_v32 }
  0xb1   : > { %v787_v2 = vsub.f32 %v2462_v56, %v2651_v23  ;;  %v788_v26 = vsub.f32 %v2470_v57, %v2651_v23  ;;  %v771_v47 = vsub.f32 %v2344_v55, %v2651_v23  ;;  %v772_v28 = vsub.f32 %v2355_v24, %v2651_v23 }
  0xb2   : > { %v789_v19 = vsub.f32 %v2476_v61, %v2651_v23  ;;  %v790_v41 = vsub.f32 %v2482_v62, %v2651_v23  ;;  %v773_v56 = vsub.f32 %v2381_v13, %v2651_v23  ;;  %v774_v57 = vsub.f32 %v2394_v7, %v2651_v23 }
  0xb3   : > { %v841_v18 = vmul.f32 1.442695, %v787_v2  ;;  %v843_v51 = vmul.f32 1.442695, %v788_v26  ;;  %v809_v15 = vmul.f32 1.442695, %v771_v47  ;;  %v791_v24 = vsub.f32 %v2489_v1, %v2651_v23 }
  0xb4   : > { %v811_v37 = vmul.f32 1.442695, %v772_v28  ;;  %v845_v55 = vmul.f32 1.442695, %v789_v19  ;;  %v847_v61 = vmul.f32 1.442695, %v790_v41  ;;  %v792_v62 = vsub.f32 %v2495_v3, %v2651_v23 }
  0xb5   : > { %1571 = vpow2.f32 %v841_v18  ;;  %v813_v54 = vmul.f32 1.442695, %v773_v56  ;;  %v775_v17 = vsub.f32 %v2361_v49, %v2651_v23  ;;  %v815_v13 = vmul.f32 1.442695, %v774_v57 }
  0xb6   : > { %1573 = vpow2.f32 %v843_v51  ;;  %v776_v7 = vsub.f32 %v2367_v36, %v2651_v23  ;;  %v849_v42 = vmul.f32 1.442695, %v791_v24  ;;  %v793_v1 = vsub.f32 %v2501_v9, %v2651_v23 }
  0xb7   : > { %1575 = vpow2.f32 %v809_v15  ;;  %v851_v31 = vmul.f32 1.442695, %v792_v62  ;;  %v794_v3 = vsub.f32 %v2512_v38, %v2651_v23  ;;  %v817_v22 = vmul.f32 1.442695, %v775_v17 }
  0xb8   : > { %1577 = vpow2.f32 %v811_v37  ;;  %v777_v49 = vsub.f32 %v2387_v20, %v2651_v23  ;;  %v819_v5 = vmul.f32 1.442695, %v776_v7  ;;  %v778_v36 = vsub.f32 %v2400_v11, %v2651_v23 }
  0xb9   : > { %1579 = vpow2.f32 %v845_v55  ;;  %v853_v59 = vmul.f32 1.442695, %v793_v1  ;;  %v795_v9 = vsub.f32 %v2518_v50, %v2651_v23  ;;  %v855_v48 = vmul.f32 1.442695, %v794_v3 }
  0xba   : > { %1581 = vpow2.f32 %v847_v61  ;;  %v796_v38 = vsub.f32 %v2524_v60, %v2651_v23  ;;  %v821_v32 = vmul.f32 1.442695, %v777_v49  ;;  %v779_v20 = vsub.f32 %v2408_v21, %v2651_v23 }
  0xbb   : > { %1583 = vpow2.f32 %v813_v54  ;;  %v823_v2 = vmul.f32 1.442695, %v778_v36  ;;  %v780_v11 = vsub.f32 %v2414_v12, %v2651_v23  ;;  %v797_v50 = vsub.f32 %v2531_v43, %v2651_v23 }
  0xbc   : > { %1585 = vpow2.f32 %v815_v13  ;;  %v857_v28 = vmul.f32 1.442695, %v795_v9  ;;  %v798_v60 = vsub.f32 %v2537_v39, %v2651_v23  ;;  %v859_v41 = vmul.f32 1.442695, %v796_v38 }
  0xbd   : > { %1587 = vpow2.f32 %v849_v42  ;;  %v781_v21 = vsub.f32 %v2420_v35, %v2651_v23  ;;  %v825_v12 = vmul.f32 1.442695, %v779_v20  ;;  %v827_v43 = vmul.f32 1.442695, %v780_v11 }
  0xbe   : > { %1589 = vpow2.f32 %v851_v31  ;;  %v861_v56 = vmul.f32 1.442695, %v797_v50  ;;  %v782_v37 = vsub.f32 %v2428_v40, %v2651_v23  ;;  %v863_v55 = vmul.f32 1.442695, %v798_v60 }
  0xbf   : > { %v1572_v10 = vpop.eup %1571  ;;  %1591 = vpow2.f32 %v817_v22  ;;  %v803_v35 = vsub.f32 %v2566_v58, %v2651_v23  ;;  %v829_v61 = vmul.f32 1.442695, %v781_v21  ;;  %v804_v62 = vsub.f32 %v2571_v29, %v2651_v23 }
  0xc0   : > { %v1574_v16 = vpop.eup %1573  ;;  %1593 = vpow2.f32 %v819_v5  ;;  %v799_v54 = vsub.f32 %v2543_v25, %v2651_v23  ;;  %v785_v13 = vsub.f32 %v2450_v52, %v2651_v23  ;;  %v786_v7 = vsub.f32 %v2456_v53, %v2651_v23 }
  0xc1   : > { %v1576_v26 = vpop.eup %1575  ;;  %v1368_v47 = vpack.c.bf16 %v1574_v16, %v1572_v10  ;;  %1595 = vpow2.f32 %v853_v59  ;;  %v831_v42 = vmul.f32 1.442695, %v782_v37  ;;  %v800_v1 = vsub.f32 %v2550_v4, %v2651_v23 }
  0xc2   : > { %v1578_v19 = vpop.eup %1577  ;;  %1597 = vpow2.f32 %v855_v48  ;;  %v873_v25 = vmul.f32 1.442695, %v803_v35  ;;  %v783_v3 = vsub.f32 %v2434_v44, %v2651_v23  ;;  %v875_v52 = vmul.f32 1.442695, %v804_v62 }
  0xc3   : > { %v1580_v18 = vpop.eup %1579  ;;  %1369 = vmatprep.subr.bf16.mxu0 %v1368_v47  ;;  %v1370_v51 = vpack.c.bf16 %v1578_v19, %v1576_v26  ;;  %1599 = vpow2.f32 %v821_v32  ;;  %v784_v53 = vsub.f32 %v2440_v45, %v2651_v23  ;;  %v865_v36 = vmul.f32 1.442695, %v799_v54 }
  0xc4   : > { %v1582_v15 = vpop.eup %1581  ;;  %1601 = vpow2.f32 %v823_v2  ;;  %v805_v4 = vsub.f32 %v2578_v30, %v2651_v23  ;;  %v1780_v59 = vmov 0   ;;  %v867_v48 = vmul.f32 1.442695, %v800_v1 }
  0xc5   : > { %v1584_v57 = vpop.eup %1583  ;;  %1371 = vmatpush3.bf16.msra.mxu0 %v1370_v51  ;;  %v1372_v39 = vpack.c.bf16 %v1582_v15, %v1580_v18  ;;  %1603 = vpow2.f32 %v857_v28  ;;  %1491 = vset.pattern.permute.xlu1 %v1780_v59  ;;  %v806_v44 = vsub.f32 %v2627_v33, %v2651_v23  ;;  %v833_v10 = vmul.f32 1.442695, %v783_v3 }
  0xc6   : > { %v1586_v24 = vpop.eup %1585  ;;  %1605 = vpow2.f32 %v859_v41  ;;  %1492 = vset.pattern.permute.xlu0 %v1780_v59  ;;  %v801_v32 = vsub.f32 %v2555_v46, %v2651_v23  ;;  %v835_v30 = vmul.f32 1.442695, %v784_v53  ;;  %v802_v16 = vsub.f32 %v2560_v34, %v2651_v23 }
  0xc7   : > { %v1588_v17 = vpop.eup %1587  ;;  %1373 = vmatprep.subr.bf16.mxu0 %v1372_v39  ;;  %v1374_v40 = vpack.c.bf16 %v1586_v24, %v1584_v57  ;;  %1607 = vpow2.f32 %v825_v12  ;;  %v877_v33 = vmul.f32 1.442695, %v805_v4  ;;  %v879_v26 = vmul.f32 1.442695, %v806_v44  ;;  %v2943_v4 = vld [vmem:[#allocation21_spill] sm:$0xff] }
  0xc8   : > { %v1590_v58 = vpop.eup %1589  ;;  %1609 = vpow2.f32 %v827_v43  ;;  %v869_v60 = vmul.f32 1.442695, %v801_v32  ;;  %v807_v46 = vsub.f32 %v2633_v0, %v2651_v23  ;;  %v871_v41 = vmul.f32 1.442695, %v802_v16 }
  0xc9   : > { %v1592_v29 = vpop.eup %1591  ;;  %1375 = vmatpush3.bf16.msra.mxu0 %v1374_v40  ;;  %v1376_v31 = vpack.c.bf16 %v1590_v58, %v1588_v17  ;;  %1611 = vpow2.f32 %v861_v56  ;;  %v808_v34 = vsub.f32 %v2608_v8, %v2651_v23  ;;  %v837_v51 = vmul.f32 1.442695, %v785_v13  ;;  %s2745_s30 = spop %1416 }
  0xca   : > { %v1594_v22 = vpop.eup %1593  ;;  %1613 = vpow2.f32 %v863_v55  ;;  %v839_v15 = vmul.f32 1.442695, %v786_v7  ;;  %v881_v37 = vmul.f32 1.442695, %v807_v46  ;;  %s1136_s6 = ssub.f32 %s1121_s21, %s2745_s30 }
  0xcb   : > { %v1596_v49 = vpop.eup %1595  ;;  %1377 = vmatprep.subr.bf16.mxu0 %v1376_v31  ;;  %v1378_v5 = vpack.c.bf16 %v1594_v22, %v1592_v29  ;;  %1615 = vpow2.f32 %v829_v61  ;;  %v883_v57 = vmul.f32 1.442695, %v808_v34 }
  0xcc   : > { %v1598_v9 = vpop.eup %1597  ;;  %1617 = vpow2.f32 %v831_v42  ;;  %v1137_v63 = vstv %s1136_s6 }
  0xcd   : > { %v1600_v38 = vpop.eup %1599  ;;  %1379 = vmatpush3.bf16.msra.mxu0 %v1378_v5  ;;  %v1380_v45 = vpack.c.bf16 %v1598_v9, %v1596_v49  ;;  %1619 = vpow2.f32 %v873_v25 }
  0xce   : > { %v1602_v20 = vpop.eup %1601  ;;  %1621 = vpow2.f32 %v875_v52  ;;  %v1101_v52 = vld [vmem:[#allocation4] sm:$0xff] }
  0xcf   : > { %v1604_v2 = vpop.eup %1603  ;;  %1381 = vmatprep.subr.bf16.mxu0 %v1380_v45  ;;  %v1382_v11 = vpack.c.bf16 %v1602_v20, %v1600_v38  ;;  %1623 = vpow2.f32 %v865_v36  ;;  %v2941_v36 = vmov 1.0   ;;  %v1102_v38 = vld [vmem:[#allocation4 + $0x8] sm:$0xff] }
  0xd0   : > { %v1606_v50 = vpop.eup %1605  ;;  %1625 = vpow2.f32 %v867_v48 }
  0xd1   : > { %v1608_v47 = vpop.eup %1607  ;;  %1383 = vmatpush3.bf16.msra.mxu0 %v1382_v11  ;;  %v1384_v28 = vpack.c.bf16 %v1606_v50, %v1604_v2  ;;  %1627 = vpow2.f32 %v833_v10 }
  0xd2   : > { %v1610_v19 = vpop.eup %1609  ;;  %1629 = vpow2.f32 %v835_v30 }
  0xd3   : > { %v1612_v21 = vpop.eup %1611  ;;  %1385 = vmatprep.subr.bf16.mxu0 %v1384_v28  ;;  %v1386_v18 = vpack.c.bf16 %v1610_v19, %v1608_v47  ;;  %1631 = vpow2.f32 %v877_v33 }
  0xd4   : > { %v1614_v12 = vpop.eup %1613  ;;  %1633 = vpow2.f32 %v879_v26 }
  0xd5   : > { %v1616_v43 = vpop.eup %1615  ;;  %1387 = vmatpush3.bf16.msra.mxu0 %v1386_v18  ;;  %v1388_v56 = vpack.c.bf16 %v1614_v12, %v1612_v21  ;;  %1635 = vpow2.f32 %v869_v60  ;;  %v1152_v12 = vstv %s2745_s30 }
  0xd6   : > { %v1618_v0 = vpop.eup %1617  ;;  %1637 = vpow2.f32 %v871_v41  ;;  %v1302_v41 = vld [vmem:[#allocation3] ss:$0 sm:$0xff] }
  0xd7   : > { %v1620_v39 = vpop.eup %1619  ;;  %1389 = vmatprep.subr.bf16.mxu0 %v1388_v56  ;;  %v1390_v55 = vpack.c.bf16 %v1618_v0, %v1616_v43  ;;  %1639 = vpow2.f32 %v837_v51 }
  0xd8   : > { %v1622_v23 = vpop.eup %1621  ;;  %1641 = vpow2.f32 %v839_v15 }
  0xd9   : > { %v1624_v8 = vpop.eup %1623  ;;  %1391 = vmatpush3.bf16.msra.mxu0 %v1390_v55  ;;  %v1400_v35 = vpack.c.bf16 %v1622_v23, %v1620_v39  ;;  %1643 = vpow2.f32 %v881_v37 }
  0xda   : > { %v1626_v24 = vpop.eup %1625  ;;  %1645 = vpow2.f32 %v883_v57 }
  0xdb   : > { %v1628_v61 = vpop.eup %1627  ;;  %1401 = vmatprep.subr.bf16.mxu1 %v1400_v35  ;;  %v1392_v62 = vpack.c.bf16 %v1626_v24, %v1624_v8 }
  0xdc   : > { %v1630_v54 = vpop.eup %1629  ;;  %1403 = vmatpush3.bf16.msra.mxu1 %v1400_v35 }
  0xdd   : > { %v1632_v17 = vpop.eup %1631  ;;  %1393 = vmatprep.subr.bf16.mxu0 %v1392_v62  ;;  %v1394_v40 = vpack.c.bf16 %v1630_v54, %v1628_v61 }
  0xde   : > { %v1634_v13 = vpop.eup %1633  ;;  %v1107_v49 = vpop.xlane.xlu0 %1106 }
  0xdf   : > { %v1636_v7 = vpop.eup %1635  ;;  %1395 = vmatpush3.bf16.msra.mxu0 %v1394_v40  ;;  %v1404_v58 = vpack.c.bf16 %v1634_v13, %v1632_v17  ;;  %v1113_v5 = vadd.f32 %v1107_v49, %v1101_v52 }
  0xe0   : > { %v1638_v42 = vpop.eup %1637 }
  0xe1   : > { %v1640_v1 = vpop.eup %1639  ;;  %1405 = vmatprep.subr.bf16.mxu1 %v1404_v58  ;;  %v1396_v29 = vpack.c.bf16 %v1638_v42, %v1636_v7  ;;  %1116 = vst.msk [vmem:[#allocation4] sm:$0xff] %vm288_vm4, %v1113_v5 }
  0xe2   : > { %v1642_v31 = vpop.eup %1641  ;;  %1407 = vmatpush3.bf16.msra.mxu1 %v1404_v58 }
  0xe3   : > { %v1644_v25 = vpop.eup %1643  ;;  %1397 = vmatprep.subr.bf16.mxu0 %v1396_v29  ;;  %v1398_v3 = vpack.c.bf16 %v1642_v31, %v1640_v1 }
  0xe4   : > { %v1646_v22 = vpop.eup %1645 }
  0xe5   : > { %1399 = vmatpush3.bf16.msra.mxu0 %v1398_v3  ;;  %v1408_v53 = vpack.c.bf16 %v1646_v22, %v1644_v25 }
  0xe7   : > { %1410 = vmatprep.subr.msk.bf16.mxu1 %vm1409_vm9, %v1408_v53 }
  0xe8   : > { %1413 = vmatpush3.bf16.msk.msra.mxu1 %vm1409_vm9, %v1408_v53  ;;  %1296 = vmatmul.mubr.msk.f32.vlgmr.msra.gmra.mrb[0].mxu0 %vm2942_vm10, %v2941_v36  ;;  %v1125_v59 = vld [vmem:[#allocation4] sm:$0xff] }
  0xe9   : > { %1297 = vmatprep.mubr.msk.f32.mxu0 %vm921_vm0, %v2941_v36  ;;  %v1127_v9 = vmax.f32 %v1125_v59, 1.0 }
  0xeb   : > { %1366 = vmatmul.mubr.msk.f32.vlgmr.msra.gmra.mrb[0].mxu1 %vm2944_vm11, %v2943_v4  ;;  %1647 = vlog2.f32 %v1127_v9 }
  0xec   : > { %1298 = vmatmul.mubr.msk.f32.gmra.mrb[2].mxu0 %vm920_vm1, %v2941_v36 }
  0xf5   : > { %v1648_v14 = vpop.eup %1647 }
  0xf6   : > { %v1130_v48 = vmul.f32 0.6931472, %v1648_v14 }
  0xf8   : > { %v1138_v44 = vmul.f32 %v1137_v63, %v1130_v48 }
  0xfa   : > { %1157 = vperm.xlu1 %1491, %v1138_v44  }
 0x125   : > { %v1112_v45 = vpop.xlane.xlu0 %1111 }
 0x126   : > { %v1114_v10 = vadd.f32 %v1112_v45, %v1102_v38 }
 0x128   : > { %1117 = vst.msk [vmem:[#allocation4 + $0x8] sm:$0xff] %vm288_vm4, %v1114_v10 }
 0x12f   : > { %v1126_v6 = vld [vmem:[#allocation4 + $0x8] sm:$0xff] }
 0x130   : > { %v1128_v27 = vmax.f32 %v1126_v6, 1.0 }
 0x132   : > { %1649 = vlog2.f32 %v1128_v27 }
 0x13c   : > { %v1650_v32 = vpop.eup %1649 }
 0x13d   : > { %v1132_v20 = vmul.f32 0.6931472, %v1650_v32 }
 0x13f   : > { %v1139_v30 = vmul.f32 %v1137_v63, %v1132_v20 }
 0x141   : > { %1162 = vperm.xlu1 %1491, %v1139_v30  }
 0x179   : > { %v1158_v51 = vpop.permute.xlu1 %1157 }
 0x1bb   : > { %v1339_v16 = vpop.f32.mrb[0].mxu0 }
 0x1bc   : > { %v1340_v2 = vpop.f32.mrb[1].mxu0 }
 0x1bd   : > { %v1341_v11 = vadd.f32 %v1340_v2, %v1339_v16 }
 0x1be   : > { %v1367_v33 = vpop.f32.mrb[0].mxu1 }
 0x1bf   : > { %v1088_v50 = vpop.f32.mrb[1].mxu1  ;;  %v1342_v26 = vpop.f32.mrb[2].mxu0 }
 0x1c0   : > { %v1089_v47 = vadd.f32 %v1341_v11, %v1088_v50  ;;  %v1343_v28 = vpop.f32.mrb[3].mxu0  ;;  %v1163_v39 = vpop.permute.xlu1 %1162 }
 0x1c1   : > { %v1344_v60 = vadd.f32 %v1343_v28, %v1342_v26 }
 0x1c2   : > { %1651 = vlog2.f32 %v1089_v47 }
 0x1c3   : > { %v1094_v46 = vadd.f32 %v1367_v33, %v1344_v60 }
 0x1c5   : > { %1653 = vlog2.f32 %v1094_v46 }
 0x1cc   : > { %v1652_v19 = vpop.eup %1651 }
 0x1cd   : > { %v1141_v34 = vmul.f32 0.6931472, %v1652_v19 }
 0x1cf   : > { %v1654_v21 = vpop.eup %1653  ;;  %v1150_v18 = vadd.f32 %v1302_v41, %v1141_v34 }
 0x1d0   : > { %v1143_v15 = vmul.f32 0.6931472, %v1654_v21 }
 0x1d1   : > { %v1153_v43 = vmul.f32 %v1152_v12, %v1150_v18 }
 0x1d2   : > { %v1151_v56 = vadd.f32 %v1302_v41, %v1143_v15 }
 0x1d3   : > { %v1165_v37 = vadd.f32 %v1158_v51, %v1153_v43 }
 0x1d4   : > { %v1154_v0 = vmul.f32 %v1152_v12, %v1151_v56 }
 0x1d5   : > { %v1167_v57 = vmul.f32 1.442695, %v1165_v37 }
 0x1d6   : > { %v1166_v55 = vadd.f32 %v1163_v39, %v1154_v0 }
 0x1d7   : > { %1655 = vpow2.f32 %v1167_v57 }
 0x1d8   : > { %v1169_v23 = vmul.f32 1.442695, %v1166_v55 }
 0x1da   : > { %1657 = vpow2.f32 %v1169_v23 }
 0x1e1   : > { %v1656_v8 = vpop.eup %1655 }
 0x1e2   : > { %1171 = vst [vmem:[%s275_s13] sm:$0xff] %v1656_v8 }
 0x1e4   : > { %v1658_v35 = vpop.eup %1657 }
 0x1e5   : > { %1172 = vst [vmem:[%s275_s13 + $0x8] sm:$0xff] %v1658_v35 }
 0x1e6   : > { %1702 = shalt.err (!%p1699_p3)
}
 0x1e7   : > { %s1703_s18 = scalar_lea.hbm %s2755_s19, 256  ;;  %s1707_s21 = scalar_lea.hbm %s2811_s5, 512 }
 0x1e8   : > { %p1704_p5 = scmp.ne.s32.totalorder %s2755_s19, %s1703_s18  ;;  %p1708_p12 = scmp.lt.u32.totalorder %s2755_s19, %s2811_s5 }
 0x1e9   : > { %p1709_p2 = scmp.lt.u32.totalorder %s1707_s21, %s1703_s18  ;;  %p1711_p8 = scmp.lt.u32.totalorder %s1703_s18, %s2755_s19 }
 0x1ea   : > { %p1705_p6 = pnand %p1704_p5, %p2945_p9 }
 0x1eb   : > { %p1710_p4 = por %p1709_p2, %p1708_p12 }
 0x1ec   : > { %p1706_p7 = pneg %p1705_p6 }
 0x1ed   : > { %p1712_p11 = por %p1711_p8, %p1710_p4 }
 0x1ef   : > { %p1713_p0 = pnand %p1712_p11, %p1706_p7 }
 0x1f1   : > { %1716 = shalt.err (!%p1713_p0)
}
 0x1f2   : > { %s1783_s7 = smov 128   ;;  %s1784_s12 = smov 256  }
 0x1f3   : > { %s1785_s13 = smov 8  }
 0x1f4   : > { %1420 = dma.vmem_to_hbm [thread:$0]  (%p2945_p9), %s2757_s14, 256, %s2755_s19, %s1174_s23, %s1783_s7, %s1784_s12, %s1785_s13  }
 0x1f5 PF: > { %s1201_s16 = sand.u32 1, %s1751_s24   ;;  %p2946_p10 = scmp.ne.s32.totalorder %s2850_s11, 0 }
 0x1f6   : > { %p2947_p13 = scmp.ge.s32.totalorder %s1771_s28, 2  ;;  %s1202_s17 = scalar_lea.sflag [#allocation10], %s1201_s16 }
 0x1f8   : > { %p1427_p1 = pnand %p2947_p13, %p2946_p10 }
 0x1fa   : > { %1746 = dma.done.wait (!%p1427_p1), %s1202_s17, 256  }
 0x1fb   : > { %1748 = vsyncadd (!%p1427_p1), %s1202_s17, 4294967040  ;;  %s24_s28 = sadd.s32 1, %s1771_s28   ;;  %s2948_s24 = smov %s1755_s25 }
 0x1fc   : > { %p21_p3 = scmp.ge.s32.totalorder %s24_s28, 4   ;;  %s2949_s25 = smov %s1759_s26 }
 0x1fd   : > { %s2950_s26 = smov %s1881_s10  ;;  %s2951_s27 = smov %s1767_s0 }
 0x1fe   : > { %s2952_s0 = smov %s2954_s29  ;;  %23 = sbr.rel (!%p21_p3) target bundleno = 10 (0xa), region = 100 }
 0x205   :  { %1207 = vsyncpa [#allocation9], 1 }
 0x206   :  { %1209 = vsyncpa [#allocation9 + $0x1], 1 }
 0x207   :  { %1210 = vsyncpa [#allocation10], 1 }
 0x208   :  { %1212 = vsyncpa [#allocation10 + $0x1], 1 }

</bundles_post_ra>
